<compile_context>
chip_gen: v7x
topology: tpu7x:2x2x1
jax: 0.10.0
libtpu: 0.0.40
codegen_flags: <defaults>
</compile_context>

<pallas_src>
import numpy as np
import jax
import jax.numpy as jnp
from jax.experimental import pallas as pl
from jax.experimental.pallas import tpu as pltpu


# --------------------------------------------------------------------------
# Pallas kernel: both 2-layer LSTMs (block-diag fused) + all linear layers
# --------------------------------------------------------------------------
def _make_kernel(Tc, Tp, H):
    Tmax = max(Tc, Tp)
    H2 = 2 * H          # both-chain state width
    G = 8 * H           # both-chain gate width

    def kernel(x_ref, ari_ref, w0_ref, b0_ref, w1_ref, b1_ref,
               wl_ref, bl_ref, wr1_ref, be1_ref, w2_ref, be2_ref,
               out_ref):
        B = x_ref.shape[1]
        w0 = w0_ref[...]
        w1 = w1_ref[...]
        # hoist bias broadcasts out of the (unrolled) time loop
        b0 = jnp.broadcast_to(b0_ref[...], (B, G))
        b1 = jnp.broadcast_to(b1_ref[...], (B, G))

        def fused_cell(inp, c_both, w, b):
            # gates for BOTH chains: columns [I(2H) | F(2H) | Gg(2H) | O(2H)],
            # each gate block laid out as [chain_close(H) | chain_period(H)].
            gates = jnp.dot(inp, w, preferred_element_type=jnp.float32) + b
            sg = jax.nn.sigmoid(gates)                 # one pass over full tile
            i = sg[:, 0 * H2:1 * H2]
            f = sg[:, 1 * H2:2 * H2]
            o = sg[:, 3 * H2:4 * H2]
            g = jnp.tanh(gates[:, 2 * H2:3 * H2])
            c_new = f * c_both + i * g
            h_new = o * jnp.tanh(c_new)
            return h_new, c_new

        z = jnp.zeros((B, H2), jnp.float32)
        h0, c0, h1, c1 = z, z, z, z

        for t in range(Tmax):                           # static, fully unrolled
            x_t = x_ref[t]                              # (B, 2D) = [xc_t | xp_t]
            inp0 = jnp.concatenate([x_t, h0], axis=-1)  # (B, 2D + 2H)
            h0n, c0n = fused_cell(inp0, c0, w0, b0)
            inp1 = jnp.concatenate([h0n, h1], axis=-1)  # (B, 4H)
            h1n, c1n = fused_cell(inp1, c1, w1, b1)
            if t >= Tc:   # close chain finished -> freeze its (left) halves
                h0n = jnp.concatenate([h0[:, :H], h0n[:, H:]], axis=-1)
                c0n = jnp.concatenate([c0[:, :H], c0n[:, H:]], axis=-1)
                h1n = jnp.concatenate([h1[:, :H], h1n[:, H:]], axis=-1)
                c1n = jnp.concatenate([c1[:, :H], c1n[:, H:]], axis=-1)
            if t >= Tp:   # period chain finished -> freeze its (right) halves
                h0n = jnp.concatenate([h0n[:, :H], h0[:, H:]], axis=-1)
                c0n = jnp.concatenate([c0n[:, :H], c0[:, H:]], axis=-1)
                h1n = jnp.concatenate([h1n[:, :H], h1[:, H:]], axis=-1)
                c1n = jnp.concatenate([c1n[:, :H], c1[:, H:]], axis=-1)
            h0, c0, h1, c1 = h0n, c0n, h1n, c1n

        # last-step top-layer hidden states: out = h_close + h_period
        out = h1[:, :H] + h1[:, H:]                     # (B, H)

        # ---- epilogue (runs once, tiny) — VPU broadcast / lane-reduce ----
        # model_pred = out @ wl + bl        (wl passed transposed: (1, H))
        model_pred = (jnp.sum(out * wl_ref[...], axis=-1, keepdims=True)
                      + bl_ref[...])                    # (B, 1)
        # esm_1 = cat([model_pred, ari], 1) @ W1 + b     (W1: (2, LH))
        esm_1 = (model_pred * wr1_ref[0:1, :]
                 + ari_ref[...] * wr1_ref[1:2, :]
                 + be1_ref[...])                        # (B, LH)
        # esm_pred = esm_1 @ w2 + be2       (w2 passed transposed: (1, LH))
        esm_pred = (jnp.sum(esm_1 * w2_ref[...], axis=-1, keepdims=True)
                    + be2_ref[...])                     # (B, 1)
        out_ref[...] = esm_pred

    return kernel


# --------------------------------------------------------------------------
# Weight packing: block-diagonal (close/period) + fused (ih|hh) per layer
# --------------------------------------------------------------------------
def _pack_block_diag(wih_c, whh_c, wih_p, whh_p, H):
    """(2*Din + 2*H, 8*H) fused weight.
    Rows:    [x_close(Din) | x_period(Din) | h_close(H) | h_period(H)]
    Columns: [I(2H) | F(2H) | G(2H) | O(2H)], each = [chain_close | chain_period].
    Inputs are pre-transposed (K, 4H) with PyTorch gate order i,f,g,o."""
    Din = wih_c.shape[0]
    W = jnp.zeros((2 * Din + 2 * H, 8 * H), jnp.float32)

    def place(W, w, row_off, chain):
        for k in range(4):
            col = k * 2 * H + chain * H
            W = W.at[row_off:row_off + w.shape[0], col:col + H].set(
                w[:, k * H:(k + 1) * H])
        return W

    W = place(W, wih_c, 0, 0)
    W = place(W, wih_p, Din, 1)
    W = place(W, whh_c, 2 * Din, 0)
    W = place(W, whh_p, 2 * Din + H, 1)
    return W


def _pack_block_bias(b_c, b_p, H):
    b = jnp.zeros((1, 8 * H), jnp.float32)
    for k in range(4):
        b = b.at[:, k * 2 * H:k * 2 * H + H].set(b_c[:, k * H:(k + 1) * H])
        b = b.at[:, k * 2 * H + H:(k + 1) * 2 * H].set(b_p[:, k * H:(k + 1) * H])
    return b


# --------------------------------------------------------------------------
# Wrapper
# --------------------------------------------------------------------------
@jax.jit
def esm_lstm_forward(xc, xp, ari_res, params):
    """xc: (B, Tc, D), xp: (B, Tp, D), ari_res: (B, 1) — all float32."""
    B, Tc, D = xc.shape
    _, Tp, _ = xp.shape
    H = params["c_whh0"].shape[0]
    assert params["wl"].shape[1] == 1, "cat((model_pred, ari_res),1) forces out_dim==1"

    # combine the two sequences along features, time-major (Tmax, B, 2D)
    Tmax = max(Tc, Tp)
    xc_p = jnp.pad(xc, ((0, 0), (0, Tmax - Tc), (0, 0))) if Tc < Tmax else xc
    xp_p = jnp.pad(xp, ((0, 0), (0, Tmax - Tp), (0, 0))) if Tp < Tmax else xp
    x_tm = jnp.transpose(jnp.concatenate([xc_p, xp_p], axis=-1), (1, 0, 2))

    W0 = _pack_block_diag(params["c_wih0"], params["c_whh0"],
                          params["p_wih0"], params["p_whh0"], H)
    b0 = _pack_block_bias(params["c_b0"], params["p_b0"], H)
    W1 = _pack_block_diag(params["c_wih1"], params["c_whh1"],
                          params["p_wih1"], params["p_whh1"], H)
    b1 = _pack_block_bias(params["c_b1"], params["p_b1"], H)

    ordered = [
        x_tm, ari_res,
        W0, b0, W1, b1,
        params["wl"].T, params["bl"],      # (1, H), (1, 1)
        params["w1"], params["be1"],       # (2, LH), (1, LH)
        params["w2"].T, params["be2"],     # (1, LH), (1, 1)
    ]

    vmem = pl.BlockSpec(memory_space=pltpu.MemorySpace.VMEM)
    kernel = _make_kernel(Tc, Tp, H)
    return pl.pallas_call(
        kernel,
        out_shape=jax.ShapeDtypeStruct((B, 1), jnp.float32),
        in_specs=[vmem] * len(ordered),
        out_specs=vmem,
    )(*ordered)


# --------------------------------------------------------------------------
# Pure-JAX reference (same math, no Pallas) for a correctness check
# --------------------------------------------------------------------------
def _ref_cell(x_t, h, c, w_ih, w_hh, b, H):
    gates = x_t @ w_ih + h @ w_hh + b
    i = jax.nn.sigmoid(gates[:, 0 * H:1 * H])
    f = jax.nn.sigmoid(gates[:, 1 * H:2 * H])
    g = jnp.tanh(gates[:, 2 * H:3 * H])
    o = jax.nn.sigmoid(gates[:, 3 * H:4 * H])
    c_new = f * c + i * g
    h_new = o * jnp.tanh(c_new)
    return h_new, c_new


def esm_lstm_reference(xc, xp, ari_res, params):
    H = params["c_whh0"].shape[0]

    def run_lstm(x, wih0, whh0, b0, wih1, whh1, b1):
        B = x.shape[0]
        h0 = c0 = h1 = c1 = jnp.zeros((B, H), jnp.float32)
        for t in range(x.shape[1]):
            h0, c0 = _ref_cell(x[:, t, :], h0, c0, wih0, whh0, b0, H)
            h1, c1 = _ref_cell(h0, h1, c1, wih1, whh1, b1, H)
        return h1

    x = run_lstm(xc, params["c_wih0"], params["c_whh0"], params["c_b0"],
                 params["c_wih1"], params["c_whh1"], params["c_b1"])
    y = run_lstm(xp, params["p_wih0"], params["p_whh0"], params["p_b0"],
                 params["p_wih1"], params["p_whh1"], params["p_b1"])
    out = x + y
    model_pred = out @ params["wl"] + params["bl"]
    inp = jnp.concatenate([model_pred, ari_res], axis=1)
    esm_1 = inp @ params["w1"] + params["be1"]
    return esm_1 @ params["w2"] + params["be2"]


# --------------------------------------------------------------------------
# Deterministic parameter construction (shapes from esm_LSTM.__init__)
# --------------------------------------------------------------------------
def init_params(key, input_dim, hidden_dim, out_dim, linear_hidden):
    H = hidden_dim
    scale = 1.0 / np.sqrt(H)
    keys = iter(jax.random.split(key, 32))

    def u(shape):
        return jax.random.uniform(next(keys), shape, jnp.float32, -scale, scale)

    params = {}
    for prefix in ("c", "p"):  # close / period LSTMs
        # layer 0: input_dim -> H ; layer 1: H -> H  (weights pre-transposed)
        params[f"{prefix}_wih0"] = u((input_dim, 4 * H))
        params[f"{prefix}_whh0"] = u((H, 4 * H))
        params[f"{prefix}_b0"] = u((1, 4 * H)) + u((1, 4 * H))   # bias_ih + bias_hh
        params[f"{prefix}_wih1"] = u((H, 4 * H))
        params[f"{prefix}_whh1"] = u((H, 4 * H))
        params[f"{prefix}_b1"] = u((1, 4 * H)) + u((1, 4 * H))

    params["wl"] = u((H, out_dim))                 # linear_layer
    params["bl"] = u((1, out_dim))
    params["w1"] = u((2 * out_dim, linear_hidden)) # linear_layer_esm1
    params["be1"] = u((1, linear_hidden))
    params["w2"] = u((linear_hidden, out_dim))     # linear_layer_esm2
    params["be2"] = u((1, out_dim))
    return params


if __name__ == "__main__":
    # small, forward-consistent shapes
    B = 2
    input_dim = 4
    hidden_dim = 32
    out_dim = 1            # forced by cat((model_pred, ari_res), 1) vs 2*out_dim
    linear_hidden = 16
    close_size = 8
    period_size = 8

    key = jax.random.PRNGKey(0)
    k_xc, k_xp, k_ari, k_params = jax.random.split(key, 4)

    xc = jax.random.normal(k_xc, (B, close_size, input_dim), jnp.float32)
    xp = jax.random.normal(k_xp, (B, period_size, input_dim), jnp.float32)
    ari_res = jax.random.normal(k_ari, (B, 1), jnp.float32)

    params = init_params(k_params, input_dim, hidden_dim, out_dim, linear_hidden)

    pred = esm_lstm_forward(xc, xp, ari_res, params)
    pred = jax.block_until_ready(pred)

    ref = esm_lstm_reference(xc, xp, ari_res, params)
    np.testing.assert_allclose(np.asarray(pred), np.asarray(ref), rtol=1e-4, atol=1e-5)

    print("KERNEL_OK")
</pallas_src>

<mosaic_0001>
module attributes {stable_mosaic.version = 11 : i64} {
  func.func @kernel(%arg0: memref<8x2x8xf32, #tpu.memory_space<vmem>>, %arg1: memref<2x1xf32, #tpu.memory_space<vmem>>, %arg2: memref<72x256xf32, #tpu.memory_space<vmem>>, %arg3: memref<1x256xf32, #tpu.memory_space<vmem>>, %arg4: memref<128x256xf32, #tpu.memory_space<vmem>>, %arg5: memref<1x256xf32, #tpu.memory_space<vmem>>, %arg6: memref<1x32xf32, #tpu.memory_space<vmem>>, %arg7: memref<1x1xf32, #tpu.memory_space<vmem>>, %arg8: memref<2x16xf32, #tpu.memory_space<vmem>>, %arg9: memref<1x16xf32, #tpu.memory_space<vmem>>, %arg10: memref<1x16xf32, #tpu.memory_space<vmem>>, %arg11: memref<1x1xf32, #tpu.memory_space<vmem>>, %arg12: memref<2x1xf32, #tpu.memory_space<vmem>>) attributes {dimension_semantics = [], scalar_prefetch = 0 : i64, scratch_operands = 0 : i64, tpu.core_type = #tpu.core_type<tc>} {
    %c0 = arith.constant 0 : index
    %c0_0 = arith.constant 0 : index
    %0 = vector.load %arg2[%c0, %c0_0] : memref<72x256xf32, #tpu.memory_space<vmem>>, vector<72x256xf32>
    %c0_1 = arith.constant 0 : index
    %c0_2 = arith.constant 0 : index
    %1 = vector.load %arg4[%c0_1, %c0_2] : memref<128x256xf32, #tpu.memory_space<vmem>>, vector<128x256xf32>
    %c0_3 = arith.constant 0 : index
    %c0_4 = arith.constant 0 : index
    %2 = vector.load %arg3[%c0_3, %c0_4] : memref<1x256xf32, #tpu.memory_space<vmem>>, vector<1x256xf32>
    %3 = vector.shape_cast %2 : vector<1x256xf32> to vector<1x256xf32>
    %4 = vector.broadcast %3 : vector<1x256xf32> to vector<2x256xf32>
    %c0_5 = arith.constant 0 : index
    %c0_6 = arith.constant 0 : index
    %5 = vector.load %arg5[%c0_5, %c0_6] : memref<1x256xf32, #tpu.memory_space<vmem>>, vector<1x256xf32>
    %6 = vector.shape_cast %5 : vector<1x256xf32> to vector<1x256xf32>
    %7 = vector.broadcast %6 : vector<1x256xf32> to vector<2x256xf32>
    %cst = arith.constant 0.000000e+00 : f32
    %8 = vector.broadcast %cst : f32 to vector<2x64xf32>
    %c0_7 = arith.constant 0 : index
    %c0_8 = arith.constant 0 : index
    %c0_9 = arith.constant 0 : index
    %9 = vector.load %arg0[%c0_7, %c0_8, %c0_9] : memref<8x2x8xf32, #tpu.memory_space<vmem>>, vector<1x2x8xf32>
    %10 = vector.shape_cast %9 : vector<1x2x8xf32> to vector<2x8xf32>
    %11 = tpu.concatenate %10, %8 in 1 : vector<2x8xf32>, vector<2x64xf32> -> vector<2x72xf32>
    %cst_10 = arith.constant dense<0.000000e+00> : vector<2x256xf32>
    %12 = tpu.matmul %11, %0, %cst_10 {dimension_numbers = #tpu.dot_dimension_numbers<[1], [0], [0], [1], [0, 0, 1, 1], [], []>} : vector<2x72xf32>, vector<72x256xf32>, vector<2x256xf32> -> vector<2x256xf32>
    %13 = arith.addf %12, %4 : vector<2x256xf32>
    %14 = arith.negf %13 : vector<2x256xf32>
    %15 = math.exp %14 : vector<2x256xf32>
    %cst_11 = arith.constant 1.000000e+00 : f32
    %16 = vector.broadcast %cst_11 : f32 to vector<2x256xf32>
    %17 = arith.addf %16, %15 : vector<2x256xf32>
    %18 = arith.divf %16, %17 : vector<2x256xf32>
    %19 = vector.extract_strided_slice %18 {offsets = [0, 0], sizes = [2, 64], strides = [1, 1]} : vector<2x256xf32> to vector<2x64xf32>
    %20 = vector.extract_strided_slice %18 {offsets = [0, 64], sizes = [2, 64], strides = [1, 1]} : vector<2x256xf32> to vector<2x64xf32>
    %21 = vector.extract_strided_slice %18 {offsets = [0, 192], sizes = [2, 64], strides = [1, 1]} : vector<2x256xf32> to vector<2x64xf32>
    %22 = vector.extract_strided_slice %13 {offsets = [0, 128], sizes = [2, 64], strides = [1, 1]} : vector<2x256xf32> to vector<2x64xf32>
    %23 = math.tanh %22 : vector<2x64xf32>
    %24 = arith.mulf %20, %8 : vector<2x64xf32>
    %25 = arith.mulf %19, %23 : vector<2x64xf32>
    %26 = arith.addf %24, %25 : vector<2x64xf32>
    %27 = math.tanh %26 : vector<2x64xf32>
    %28 = arith.mulf %21, %27 : vector<2x64xf32>
    %29 = tpu.concatenate %28, %8 in 1 : vector<2x64xf32>, vector<2x64xf32> -> vector<2x128xf32>
    %cst_12 = arith.constant dense<0.000000e+00> : vector<2x256xf32>
    %30 = tpu.matmul %29, %1, %cst_12 {dimension_numbers = #tpu.dot_dimension_numbers<[1], [0], [0], [1], [0, 0, 1, 1], [], []>} : vector<2x128xf32>, vector<128x256xf32>, vector<2x256xf32> -> vector<2x256xf32>
    %31 = arith.addf %30, %7 : vector<2x256xf32>
    %32 = arith.negf %31 : vector<2x256xf32>
    %33 = math.exp %32 : vector<2x256xf32>
    %cst_13 = arith.constant 1.000000e+00 : f32
    %34 = vector.broadcast %cst_13 : f32 to vector<2x256xf32>
    %35 = arith.addf %34, %33 : vector<2x256xf32>
    %36 = arith.divf %34, %35 : vector<2x256xf32>
    %37 = vector.extract_strided_slice %36 {offsets = [0, 0], sizes = [2, 64], strides = [1, 1]} : vector<2x256xf32> to vector<2x64xf32>
    %38 = vector.extract_strided_slice %36 {offsets = [0, 64], sizes = [2, 64], strides = [1, 1]} : vector<2x256xf32> to vector<2x64xf32>
    %39 = vector.extract_strided_slice %36 {offsets = [0, 192], sizes = [2, 64], strides = [1, 1]} : vector<2x256xf32> to vector<2x64xf32>
    %40 = vector.extract_strided_slice %31 {offsets = [0, 128], sizes = [2, 64], strides = [1, 1]} : vector<2x256xf32> to vector<2x64xf32>
    %41 = math.tanh %40 : vector<2x64xf32>
    %42 = arith.mulf %38, %8 : vector<2x64xf32>
    %43 = arith.mulf %37, %41 : vector<2x64xf32>
    %44 = arith.addf %42, %43 : vector<2x64xf32>
    %45 = math.tanh %44 : vector<2x64xf32>
    %46 = arith.mulf %39, %45 : vector<2x64xf32>
    %c1 = arith.constant 1 : index
    %c0_14 = arith.constant 0 : index
    %c0_15 = arith.constant 0 : index
    %47 = vector.load %arg0[%c1, %c0_14, %c0_15] : memref<8x2x8xf32, #tpu.memory_space<vmem>>, vector<1x2x8xf32>
    %48 = vector.shape_cast %47 : vector<1x2x8xf32> to vector<2x8xf32>
    %49 = tpu.concatenate %48, %28 in 1 : vector<2x8xf32>, vector<2x64xf32> -> vector<2x72xf32>
    %cst_16 = arith.constant dense<0.000000e+00> : vector<2x256xf32>
    %50 = tpu.matmul %49, %0, %cst_16 {dimension_numbers = #tpu.dot_dimension_numbers<[1], [0], [0], [1], [0, 0, 1, 1], [], []>} : vector<2x72xf32>, vector<72x256xf32>, vector<2x256xf32> -> vector<2x256xf32>
    %51 = arith.addf %50, %4 : vector<2x256xf32>
    %52 = arith.negf %51 : vector<2x256xf32>
    %53 = math.exp %52 : vector<2x256xf32>
    %cst_17 = arith.constant 1.000000e+00 : f32
    %54 = vector.broadcast %cst_17 : f32 to vector<2x256xf32>
    %55 = arith.addf %54, %53 : vector<2x256xf32>
    %56 = arith.divf %54, %55 : vector<2x256xf32>
    %57 = vector.extract_strided_slice %56 {offsets = [0, 0], sizes = [2, 64], strides = [1, 1]} : vector<2x256xf32> to vector<2x64xf32>
    %58 = vector.extract_strided_slice %56 {offsets = [0, 64], sizes = [2, 64], strides = [1, 1]} : vector<2x256xf32> to vector<2x64xf32>
    %59 = vector.extract_strided_slice %56 {offsets = [0, 192], sizes = [2, 64], strides = [1, 1]} : vector<2x256xf32> to vector<2x64xf32>
    %60 = vector.extract_strided_slice %51 {offsets = [0, 128], sizes = [2, 64], strides = [1, 1]} : vector<2x256xf32> to vector<2x64xf32>
    %61 = math.tanh %60 : vector<2x64xf32>
    %62 = arith.mulf %58, %26 : vector<2x64xf32>
    %63 = arith.mulf %57, %61 : vector<2x64xf32>
    %64 = arith.addf %62, %63 : vector<2x64xf32>
    %65 = math.tanh %64 : vector<2x64xf32>
    %66 = arith.mulf %59, %65 : vector<2x64xf32>
    %67 = tpu.concatenate %66, %46 in 1 : vector<2x64xf32>, vector<2x64xf32> -> vector<2x128xf32>
    %cst_18 = arith.constant dense<0.000000e+00> : vector<2x256xf32>
    %68 = tpu.matmul %67, %1, %cst_18 {dimension_numbers = #tpu.dot_dimension_numbers<[1], [0], [0], [1], [0, 0, 1, 1], [], []>} : vector<2x128xf32>, vector<128x256xf32>, vector<2x256xf32> -> vector<2x256xf32>
    %69 = arith.addf %68, %7 : vector<2x256xf32>
    %70 = arith.negf %69 : vector<2x256xf32>
    %71 = math.exp %70 : vector<2x256xf32>
    %cst_19 = arith.constant 1.000000e+00 : f32
    %72 = vector.broadcast %cst_19 : f32 to vector<2x256xf32>
    %73 = arith.addf %72, %71 : vector<2x256xf32>
    %74 = arith.divf %72, %73 : vector<2x256xf32>
    %75 = vector.extract_strided_slice %74 {offsets = [0, 0], sizes = [2, 64], strides = [1, 1]} : vector<2x256xf32> to vector<2x64xf32>
    %76 = vector.extract_strided_slice %74 {offsets = [0, 64], sizes = [2, 64], strides = [1, 1]} : vector<2x256xf32> to vector<2x64xf32>
    %77 = vector.extract_strided_slice %74 {offsets = [0, 192], sizes = [2, 64], strides = [1, 1]} : vector<2x256xf32> to vector<2x64xf32>
    %78 = vector.extract_strided_slice %69 {offsets = [0, 128], sizes = [2, 64], strides = [1, 1]} : vector<2x256xf32> to vector<2x64xf32>
    %79 = math.tanh %78 : vector<2x64xf32>
    %80 = arith.mulf %76, %44 : vector<2x64xf32>
    %81 = arith.mulf %75, %79 : vector<2x64xf32>
    %82 = arith.addf %80, %81 : vector<2x64xf32>
    %83 = math.tanh %82 : vector<2x64xf32>
    %84 = arith.mulf %77, %83 : vector<2x64xf32>
    %c2 = arith.constant 2 : index
    %c0_20 = arith.constant 0 : index
    %c0_21 = arith.constant 0 : index
    %85 = vector.load %arg0[%c2, %c0_20, %c0_21] : memref<8x2x8xf32, #tpu.memory_space<vmem>>, vector<1x2x8xf32>
    %86 = vector.shape_cast %85 : vector<1x2x8xf32> to vector<2x8xf32>
    %87 = tpu.concatenate %86, %66 in 1 : vector<2x8xf32>, vector<2x64xf32> -> vector<2x72xf32>
    %cst_22 = arith.constant dense<0.000000e+00> : vector<2x256xf32>
    %88 = tpu.matmul %87, %0, %cst_22 {dimension_numbers = #tpu.dot_dimension_numbers<[1], [0], [0], [1], [0, 0, 1, 1], [], []>} : vector<2x72xf32>, vector<72x256xf32>, vector<2x256xf32> -> vector<2x256xf32>
    %89 = arith.addf %88, %4 : vector<2x256xf32>
    %90 = arith.negf %89 : vector<2x256xf32>
    %91 = math.exp %90 : vector<2x256xf32>
    %cst_23 = arith.constant 1.000000e+00 : f32
    %92 = vector.broadcast %cst_23 : f32 to vector<2x256xf32>
    %93 = arith.addf %92, %91 : vector<2x256xf32>
    %94 = arith.divf %92, %93 : vector<2x256xf32>
    %95 = vector.extract_strided_slice %94 {offsets = [0, 0], sizes = [2, 64], strides = [1, 1]} : vector<2x256xf32> to vector<2x64xf32>
    %96 = vector.extract_strided_slice %94 {offsets = [0, 64], sizes = [2, 64], strides = [1, 1]} : vector<2x256xf32> to vector<2x64xf32>
    %97 = vector.extract_strided_slice %94 {offsets = [0, 192], sizes = [2, 64], strides = [1, 1]} : vector<2x256xf32> to vector<2x64xf32>
    %98 = vector.extract_strided_slice %89 {offsets = [0, 128], sizes = [2, 64], strides = [1, 1]} : vector<2x256xf32> to vector<2x64xf32>
    %99 = math.tanh %98 : vector<2x64xf32>
    %100 = arith.mulf %96, %64 : vector<2x64xf32>
    %101 = arith.mulf %95, %99 : vector<2x64xf32>
    %102 = arith.addf %100, %101 : vector<2x64xf32>
    %103 = math.tanh %102 : vector<2x64xf32>
    %104 = arith.mulf %97, %103 : vector<2x64xf32>
    %105 = tpu.concatenate %104, %84 in 1 : vector<2x64xf32>, vector<2x64xf32> -> vector<2x128xf32>
    %cst_24 = arith.constant dense<0.000000e+00> : vector<2x256xf32>
    %106 = tpu.matmul %105, %1, %cst_24 {dimension_numbers = #tpu.dot_dimension_numbers<[1], [0], [0], [1], [0, 0, 1, 1], [], []>} : vector<2x128xf32>, vector<128x256xf32>, vector<2x256xf32> -> vector<2x256xf32>
    %107 = arith.addf %106, %7 : vector<2x256xf32>
    %108 = arith.negf %107 : vector<2x256xf32>
    %109 = math.exp %108 : vector<2x256xf32>
    %cst_25 = arith.constant 1.000000e+00 : f32
    %110 = vector.broadcast %cst_25 : f32 to vector<2x256xf32>
    %111 = arith.addf %110, %109 : vector<2x256xf32>
    %112 = arith.divf %110, %111 : vector<2x256xf32>
    %113 = vector.extract_strided_slice %112 {offsets = [0, 0], sizes = [2, 64], strides = [1, 1]} : vector<2x256xf32> to vector<2x64xf32>
    %114 = vector.extract_strided_slice %112 {offsets = [0, 64], sizes = [2, 64], strides = [1, 1]} : vector<2x256xf32> to vector<2x64xf32>
    %115 = vector.extract_strided_slice %112 {offsets = [0, 192], sizes = [2, 64], strides = [1, 1]} : vector<2x256xf32> to vector<2x64xf32>
    %116 = vector.extract_strided_slice %107 {offsets = [0, 128], sizes = [2, 64], strides = [1, 1]} : vector<2x256xf32> to vector<2x64xf32>
    %117 = math.tanh %116 : vector<2x64xf32>
    %118 = arith.mulf %114, %82 : vector<2x64xf32>
    %119 = arith.mulf %113, %117 : vector<2x64xf32>
    %120 = arith.addf %118, %119 : vector<2x64xf32>
    %121 = math.tanh %120 : vector<2x64xf32>
    %122 = arith.mulf %115, %121 : vector<2x64xf32>
    %c3 = arith.constant 3 : index
    %c0_26 = arith.constant 0 : index
    %c0_27 = arith.constant 0 : index
    %123 = vector.load %arg0[%c3, %c0_26, %c0_27] : memref<8x2x8xf32, #tpu.memory_space<vmem>>, vector<1x2x8xf32>
    %124 = vector.shape_cast %123 : vector<1x2x8xf32> to vector<2x8xf32>
    %125 = tpu.concatenate %124, %104 in 1 : vector<2x8xf32>, vector<2x64xf32> -> vector<2x72xf32>
    %cst_28 = arith.constant dense<0.000000e+00> : vector<2x256xf32>
    %126 = tpu.matmul %125, %0, %cst_28 {dimension_numbers = #tpu.dot_dimension_numbers<[1], [0], [0], [1], [0, 0, 1, 1], [], []>} : vector<2x72xf32>, vector<72x256xf32>, vector<2x256xf32> -> vector<2x256xf32>
    %127 = arith.addf %126, %4 : vector<2x256xf32>
    %128 = arith.negf %127 : vector<2x256xf32>
    %129 = math.exp %128 : vector<2x256xf32>
    %cst_29 = arith.constant 1.000000e+00 : f32
    %130 = vector.broadcast %cst_29 : f32 to vector<2x256xf32>
    %131 = arith.addf %130, %129 : vector<2x256xf32>
    %132 = arith.divf %130, %131 : vector<2x256xf32>
    %133 = vector.extract_strided_slice %132 {offsets = [0, 0], sizes = [2, 64], strides = [1, 1]} : vector<2x256xf32> to vector<2x64xf32>
    %134 = vector.extract_strided_slice %132 {offsets = [0, 64], sizes = [2, 64], strides = [1, 1]} : vector<2x256xf32> to vector<2x64xf32>
    %135 = vector.extract_strided_slice %132 {offsets = [0, 192], sizes = [2, 64], strides = [1, 1]} : vector<2x256xf32> to vector<2x64xf32>
    %136 = vector.extract_strided_slice %127 {offsets = [0, 128], sizes = [2, 64], strides = [1, 1]} : vector<2x256xf32> to vector<2x64xf32>
    %137 = math.tanh %136 : vector<2x64xf32>
    %138 = arith.mulf %134, %102 : vector<2x64xf32>
    %139 = arith.mulf %133, %137 : vector<2x64xf32>
    %140 = arith.addf %138, %139 : vector<2x64xf32>
    %141 = math.tanh %140 : vector<2x64xf32>
    %142 = arith.mulf %135, %141 : vector<2x64xf32>
    %143 = tpu.concatenate %142, %122 in 1 : vector<2x64xf32>, vector<2x64xf32> -> vector<2x128xf32>
    %cst_30 = arith.constant dense<0.000000e+00> : vector<2x256xf32>
    %144 = tpu.matmul %143, %1, %cst_30 {dimension_numbers = #tpu.dot_dimension_numbers<[1], [0], [0], [1], [0, 0, 1, 1], [], []>} : vector<2x128xf32>, vector<128x256xf32>, vector<2x256xf32> -> vector<2x256xf32>
    %145 = arith.addf %144, %7 : vector<2x256xf32>
    %146 = arith.negf %145 : vector<2x256xf32>
    %147 = math.exp %146 : vector<2x256xf32>
    %cst_31 = arith.constant 1.000000e+00 : f32
    %148 = vector.broadcast %cst_31 : f32 to vector<2x256xf32>
    %149 = arith.addf %148, %147 : vector<2x256xf32>
    %150 = arith.divf %148, %149 : vector<2x256xf32>
    %151 = vector.extract_strided_slice %150 {offsets = [0, 0], sizes = [2, 64], strides = [1, 1]} : vector<2x256xf32> to vector<2x64xf32>
    %152 = vector.extract_strided_slice %150 {offsets = [0, 64], sizes = [2, 64], strides = [1, 1]} : vector<2x256xf32> to vector<2x64xf32>
    %153 = vector.extract_strided_slice %150 {offsets = [0, 192], sizes = [2, 64], strides = [1, 1]} : vector<2x256xf32> to vector<2x64xf32>
    %154 = vector.extract_strided_slice %145 {offsets = [0, 128], sizes = [2, 64], strides = [1, 1]} : vector<2x256xf32> to vector<2x64xf32>
    %155 = math.tanh %154 : vector<2x64xf32>
    %156 = arith.mulf %152, %120 : vector<2x64xf32>
    %157 = arith.mulf %151, %155 : vector<2x64xf32>
    %158 = arith.addf %156, %157 : vector<2x64xf32>
    %159 = math.tanh %158 : vector<2x64xf32>
    %160 = arith.mulf %153, %159 : vector<2x64xf32>
    %c4 = arith.constant 4 : index
    %c0_32 = arith.constant 0 : index
    %c0_33 = arith.constant 0 : index
    %161 = vector.load %arg0[%c4, %c0_32, %c0_33] : memref<8x2x8xf32, #tpu.memory_space<vmem>>, vector<1x2x8xf32>
    %162 = vector.shape_cast %161 : vector<1x2x8xf32> to vector<2x8xf32>
    %163 = tpu.concatenate %162, %142 in 1 : vector<2x8xf32>, vector<2x64xf32> -> vector<2x72xf32>
    %cst_34 = arith.constant dense<0.000000e+00> : vector<2x256xf32>
    %164 = tpu.matmul %163, %0, %cst_34 {dimension_numbers = #tpu.dot_dimension_numbers<[1], [0], [0], [1], [0, 0, 1, 1], [], []>} : vector<2x72xf32>, vector<72x256xf32>, vector<2x256xf32> -> vector<2x256xf32>
    %165 = arith.addf %164, %4 : vector<2x256xf32>
    %166 = arith.negf %165 : vector<2x256xf32>
    %167 = math.exp %166 : vector<2x256xf32>
    %cst_35 = arith.constant 1.000000e+00 : f32
    %168 = vector.broadcast %cst_35 : f32 to vector<2x256xf32>
    %169 = arith.addf %168, %167 : vector<2x256xf32>
    %170 = arith.divf %168, %169 : vector<2x256xf32>
    %171 = vector.extract_strided_slice %170 {offsets = [0, 0], sizes = [2, 64], strides = [1, 1]} : vector<2x256xf32> to vector<2x64xf32>
    %172 = vector.extract_strided_slice %170 {offsets = [0, 64], sizes = [2, 64], strides = [1, 1]} : vector<2x256xf32> to vector<2x64xf32>
    %173 = vector.extract_strided_slice %170 {offsets = [0, 192], sizes = [2, 64], strides = [1, 1]} : vector<2x256xf32> to vector<2x64xf32>
    %174 = vector.extract_strided_slice %165 {offsets = [0, 128], sizes = [2, 64], strides = [1, 1]} : vector<2x256xf32> to vector<2x64xf32>
    %175 = math.tanh %174 : vector<2x64xf32>
    %176 = arith.mulf %172, %140 : vector<2x64xf32>
    %177 = arith.mulf %171, %175 : vector<2x64xf32>
    %178 = arith.addf %176, %177 : vector<2x64xf32>
    %179 = math.tanh %178 : vector<2x64xf32>
    %180 = arith.mulf %173, %179 : vector<2x64xf32>
    %181 = tpu.concatenate %180, %160 in 1 : vector<2x64xf32>, vector<2x64xf32> -> vector<2x128xf32>
    %cst_36 = arith.constant dense<0.000000e+00> : vector<2x256xf32>
    %182 = tpu.matmul %181, %1, %cst_36 {dimension_numbers = #tpu.dot_dimension_numbers<[1], [0], [0], [1], [0, 0, 1, 1], [], []>} : vector<2x128xf32>, vector<128x256xf32>, vector<2x256xf32> -> vector<2x256xf32>
    %183 = arith.addf %182, %7 : vector<2x256xf32>
    %184 = arith.negf %183 : vector<2x256xf32>
    %185 = math.exp %184 : vector<2x256xf32>
    %cst_37 = arith.constant 1.000000e+00 : f32
    %186 = vector.broadcast %cst_37 : f32 to vector<2x256xf32>
    %187 = arith.addf %186, %185 : vector<2x256xf32>
    %188 = arith.divf %186, %187 : vector<2x256xf32>
    %189 = vector.extract_strided_slice %188 {offsets = [0, 0], sizes = [2, 64], strides = [1, 1]} : vector<2x256xf32> to vector<2x64xf32>
    %190 = vector.extract_strided_slice %188 {offsets = [0, 64], sizes = [2, 64], strides = [1, 1]} : vector<2x256xf32> to vector<2x64xf32>
    %191 = vector.extract_strided_slice %188 {offsets = [0, 192], sizes = [2, 64], strides = [1, 1]} : vector<2x256xf32> to vector<2x64xf32>
    %192 = vector.extract_strided_slice %183 {offsets = [0, 128], sizes = [2, 64], strides = [1, 1]} : vector<2x256xf32> to vector<2x64xf32>
    %193 = math.tanh %192 : vector<2x64xf32>
    %194 = arith.mulf %190, %158 : vector<2x64xf32>
    %195 = arith.mulf %189, %193 : vector<2x64xf32>
    %196 = arith.addf %194, %195 : vector<2x64xf32>
    %197 = math.tanh %196 : vector<2x64xf32>
    %198 = arith.mulf %191, %197 : vector<2x64xf32>
    %c5 = arith.constant 5 : index
    %c0_38 = arith.constant 0 : index
    %c0_39 = arith.constant 0 : index
    %199 = vector.load %arg0[%c5, %c0_38, %c0_39] : memref<8x2x8xf32, #tpu.memory_space<vmem>>, vector<1x2x8xf32>
    %200 = vector.shape_cast %199 : vector<1x2x8xf32> to vector<2x8xf32>
    %201 = tpu.concatenate %200, %180 in 1 : vector<2x8xf32>, vector<2x64xf32> -> vector<2x72xf32>
    %cst_40 = arith.constant dense<0.000000e+00> : vector<2x256xf32>
    %202 = tpu.matmul %201, %0, %cst_40 {dimension_numbers = #tpu.dot_dimension_numbers<[1], [0], [0], [1], [0, 0, 1, 1], [], []>} : vector<2x72xf32>, vector<72x256xf32>, vector<2x256xf32> -> vector<2x256xf32>
    %203 = arith.addf %202, %4 : vector<2x256xf32>
    %204 = arith.negf %203 : vector<2x256xf32>
    %205 = math.exp %204 : vector<2x256xf32>
    %cst_41 = arith.constant 1.000000e+00 : f32
    %206 = vector.broadcast %cst_41 : f32 to vector<2x256xf32>
    %207 = arith.addf %206, %205 : vector<2x256xf32>
    %208 = arith.divf %206, %207 : vector<2x256xf32>
    %209 = vector.extract_strided_slice %208 {offsets = [0, 0], sizes = [2, 64], strides = [1, 1]} : vector<2x256xf32> to vector<2x64xf32>
    %210 = vector.extract_strided_slice %208 {offsets = [0, 64], sizes = [2, 64], strides = [1, 1]} : vector<2x256xf32> to vector<2x64xf32>
    %211 = vector.extract_strided_slice %208 {offsets = [0, 192], sizes = [2, 64], strides = [1, 1]} : vector<2x256xf32> to vector<2x64xf32>
    %212 = vector.extract_strided_slice %203 {offsets = [0, 128], sizes = [2, 64], strides = [1, 1]} : vector<2x256xf32> to vector<2x64xf32>
    %213 = math.tanh %212 : vector<2x64xf32>
    %214 = arith.mulf %210, %178 : vector<2x64xf32>
    %215 = arith.mulf %209, %213 : vector<2x64xf32>
    %216 = arith.addf %214, %215 : vector<2x64xf32>
    %217 = math.tanh %216 : vector<2x64xf32>
    %218 = arith.mulf %211, %217 : vector<2x64xf32>
    %219 = tpu.concatenate %218, %198 in 1 : vector<2x64xf32>, vector<2x64xf32> -> vector<2x128xf32>
    %cst_42 = arith.constant dense<0.000000e+00> : vector<2x256xf32>
    %220 = tpu.matmul %219, %1, %cst_42 {dimension_numbers = #tpu.dot_dimension_numbers<[1], [0], [0], [1], [0, 0, 1, 1], [], []>} : vector<2x128xf32>, vector<128x256xf32>, vector<2x256xf32> -> vector<2x256xf32>
    %221 = arith.addf %220, %7 : vector<2x256xf32>
    %222 = arith.negf %221 : vector<2x256xf32>
    %223 = math.exp %222 : vector<2x256xf32>
    %cst_43 = arith.constant 1.000000e+00 : f32
    %224 = vector.broadcast %cst_43 : f32 to vector<2x256xf32>
    %225 = arith.addf %224, %223 : vector<2x256xf32>
    %226 = arith.divf %224, %225 : vector<2x256xf32>
    %227 = vector.extract_strided_slice %226 {offsets = [0, 0], sizes = [2, 64], strides = [1, 1]} : vector<2x256xf32> to vector<2x64xf32>
    %228 = vector.extract_strided_slice %226 {offsets = [0, 64], sizes = [2, 64], strides = [1, 1]} : vector<2x256xf32> to vector<2x64xf32>
    %229 = vector.extract_strided_slice %226 {offsets = [0, 192], sizes = [2, 64], strides = [1, 1]} : vector<2x256xf32> to vector<2x64xf32>
    %230 = vector.extract_strided_slice %221 {offsets = [0, 128], sizes = [2, 64], strides = [1, 1]} : vector<2x256xf32> to vector<2x64xf32>
    %231 = math.tanh %230 : vector<2x64xf32>
    %232 = arith.mulf %228, %196 : vector<2x64xf32>
    %233 = arith.mulf %227, %231 : vector<2x64xf32>
    %234 = arith.addf %232, %233 : vector<2x64xf32>
    %235 = math.tanh %234 : vector<2x64xf32>
    %236 = arith.mulf %229, %235 : vector<2x64xf32>
    %c6 = arith.constant 6 : index
    %c0_44 = arith.constant 0 : index
    %c0_45 = arith.constant 0 : index
    %237 = vector.load %arg0[%c6, %c0_44, %c0_45] : memref<8x2x8xf32, #tpu.memory_space<vmem>>, vector<1x2x8xf32>
    %238 = vector.shape_cast %237 : vector<1x2x8xf32> to vector<2x8xf32>
    %239 = tpu.concatenate %238, %218 in 1 : vector<2x8xf32>, vector<2x64xf32> -> vector<2x72xf32>
    %cst_46 = arith.constant dense<0.000000e+00> : vector<2x256xf32>
    %240 = tpu.matmul %239, %0, %cst_46 {dimension_numbers = #tpu.dot_dimension_numbers<[1], [0], [0], [1], [0, 0, 1, 1], [], []>} : vector<2x72xf32>, vector<72x256xf32>, vector<2x256xf32> -> vector<2x256xf32>
    %241 = arith.addf %240, %4 : vector<2x256xf32>
    %242 = arith.negf %241 : vector<2x256xf32>
    %243 = math.exp %242 : vector<2x256xf32>
    %cst_47 = arith.constant 1.000000e+00 : f32
    %244 = vector.broadcast %cst_47 : f32 to vector<2x256xf32>
    %245 = arith.addf %244, %243 : vector<2x256xf32>
    %246 = arith.divf %244, %245 : vector<2x256xf32>
    %247 = vector.extract_strided_slice %246 {offsets = [0, 0], sizes = [2, 64], strides = [1, 1]} : vector<2x256xf32> to vector<2x64xf32>
    %248 = vector.extract_strided_slice %246 {offsets = [0, 64], sizes = [2, 64], strides = [1, 1]} : vector<2x256xf32> to vector<2x64xf32>
    %249 = vector.extract_strided_slice %246 {offsets = [0, 192], sizes = [2, 64], strides = [1, 1]} : vector<2x256xf32> to vector<2x64xf32>
    %250 = vector.extract_strided_slice %241 {offsets = [0, 128], sizes = [2, 64], strides = [1, 1]} : vector<2x256xf32> to vector<2x64xf32>
    %251 = math.tanh %250 : vector<2x64xf32>
    %252 = arith.mulf %248, %216 : vector<2x64xf32>
    %253 = arith.mulf %247, %251 : vector<2x64xf32>
    %254 = arith.addf %252, %253 : vector<2x64xf32>
    %255 = math.tanh %254 : vector<2x64xf32>
    %256 = arith.mulf %249, %255 : vector<2x64xf32>
    %257 = tpu.concatenate %256, %236 in 1 : vector<2x64xf32>, vector<2x64xf32> -> vector<2x128xf32>
    %cst_48 = arith.constant dense<0.000000e+00> : vector<2x256xf32>
    %258 = tpu.matmul %257, %1, %cst_48 {dimension_numbers = #tpu.dot_dimension_numbers<[1], [0], [0], [1], [0, 0, 1, 1], [], []>} : vector<2x128xf32>, vector<128x256xf32>, vector<2x256xf32> -> vector<2x256xf32>
    %259 = arith.addf %258, %7 : vector<2x256xf32>
    %260 = arith.negf %259 : vector<2x256xf32>
    %261 = math.exp %260 : vector<2x256xf32>
    %cst_49 = arith.constant 1.000000e+00 : f32
    %262 = vector.broadcast %cst_49 : f32 to vector<2x256xf32>
    %263 = arith.addf %262, %261 : vector<2x256xf32>
    %264 = arith.divf %262, %263 : vector<2x256xf32>
    %265 = vector.extract_strided_slice %264 {offsets = [0, 0], sizes = [2, 64], strides = [1, 1]} : vector<2x256xf32> to vector<2x64xf32>
    %266 = vector.extract_strided_slice %264 {offsets = [0, 64], sizes = [2, 64], strides = [1, 1]} : vector<2x256xf32> to vector<2x64xf32>
    %267 = vector.extract_strided_slice %264 {offsets = [0, 192], sizes = [2, 64], strides = [1, 1]} : vector<2x256xf32> to vector<2x64xf32>
    %268 = vector.extract_strided_slice %259 {offsets = [0, 128], sizes = [2, 64], strides = [1, 1]} : vector<2x256xf32> to vector<2x64xf32>
    %269 = math.tanh %268 : vector<2x64xf32>
    %270 = arith.mulf %266, %234 : vector<2x64xf32>
    %271 = arith.mulf %265, %269 : vector<2x64xf32>
    %272 = arith.addf %270, %271 : vector<2x64xf32>
    %273 = math.tanh %272 : vector<2x64xf32>
    %274 = arith.mulf %267, %273 : vector<2x64xf32>
    %c7 = arith.constant 7 : index
    %c0_50 = arith.constant 0 : index
    %c0_51 = arith.constant 0 : index
    %275 = vector.load %arg0[%c7, %c0_50, %c0_51] : memref<8x2x8xf32, #tpu.memory_space<vmem>>, vector<1x2x8xf32>
    %276 = vector.shape_cast %275 : vector<1x2x8xf32> to vector<2x8xf32>
    %277 = tpu.concatenate %276, %256 in 1 : vector<2x8xf32>, vector<2x64xf32> -> vector<2x72xf32>
    %cst_52 = arith.constant dense<0.000000e+00> : vector<2x256xf32>
    %278 = tpu.matmul %277, %0, %cst_52 {dimension_numbers = #tpu.dot_dimension_numbers<[1], [0], [0], [1], [0, 0, 1, 1], [], []>} : vector<2x72xf32>, vector<72x256xf32>, vector<2x256xf32> -> vector<2x256xf32>
    %279 = arith.addf %278, %4 : vector<2x256xf32>
    %280 = arith.negf %279 : vector<2x256xf32>
    %281 = math.exp %280 : vector<2x256xf32>
    %cst_53 = arith.constant 1.000000e+00 : f32
    %282 = vector.broadcast %cst_53 : f32 to vector<2x256xf32>
    %283 = arith.addf %282, %281 : vector<2x256xf32>
    %284 = arith.divf %282, %283 : vector<2x256xf32>
    %285 = vector.extract_strided_slice %284 {offsets = [0, 0], sizes = [2, 64], strides = [1, 1]} : vector<2x256xf32> to vector<2x64xf32>
    %286 = vector.extract_strided_slice %284 {offsets = [0, 64], sizes = [2, 64], strides = [1, 1]} : vector<2x256xf32> to vector<2x64xf32>
    %287 = vector.extract_strided_slice %284 {offsets = [0, 192], sizes = [2, 64], strides = [1, 1]} : vector<2x256xf32> to vector<2x64xf32>
    %288 = vector.extract_strided_slice %279 {offsets = [0, 128], sizes = [2, 64], strides = [1, 1]} : vector<2x256xf32> to vector<2x64xf32>
    %289 = math.tanh %288 : vector<2x64xf32>
    %290 = arith.mulf %286, %254 : vector<2x64xf32>
    %291 = arith.mulf %285, %289 : vector<2x64xf32>
    %292 = arith.addf %290, %291 : vector<2x64xf32>
    %293 = math.tanh %292 : vector<2x64xf32>
    %294 = arith.mulf %287, %293 : vector<2x64xf32>
    %295 = tpu.concatenate %294, %274 in 1 : vector<2x64xf32>, vector<2x64xf32> -> vector<2x128xf32>
    %cst_54 = arith.constant dense<0.000000e+00> : vector<2x256xf32>
    %296 = tpu.matmul %295, %1, %cst_54 {dimension_numbers = #tpu.dot_dimension_numbers<[1], [0], [0], [1], [0, 0, 1, 1], [], []>} : vector<2x128xf32>, vector<128x256xf32>, vector<2x256xf32> -> vector<2x256xf32>
    %297 = arith.addf %296, %7 : vector<2x256xf32>
    %298 = arith.negf %297 : vector<2x256xf32>
    %299 = math.exp %298 : vector<2x256xf32>
    %cst_55 = arith.constant 1.000000e+00 : f32
    %300 = vector.broadcast %cst_55 : f32 to vector<2x256xf32>
    %301 = arith.addf %300, %299 : vector<2x256xf32>
    %302 = arith.divf %300, %301 : vector<2x256xf32>
    %303 = vector.extract_strided_slice %302 {offsets = [0, 0], sizes = [2, 64], strides = [1, 1]} : vector<2x256xf32> to vector<2x64xf32>
    %304 = vector.extract_strided_slice %302 {offsets = [0, 64], sizes = [2, 64], strides = [1, 1]} : vector<2x256xf32> to vector<2x64xf32>
    %305 = vector.extract_strided_slice %302 {offsets = [0, 192], sizes = [2, 64], strides = [1, 1]} : vector<2x256xf32> to vector<2x64xf32>
    %306 = vector.extract_strided_slice %297 {offsets = [0, 128], sizes = [2, 64], strides = [1, 1]} : vector<2x256xf32> to vector<2x64xf32>
    %307 = math.tanh %306 : vector<2x64xf32>
    %308 = arith.mulf %304, %272 : vector<2x64xf32>
    %309 = arith.mulf %303, %307 : vector<2x64xf32>
    %310 = arith.addf %308, %309 : vector<2x64xf32>
    %311 = math.tanh %310 : vector<2x64xf32>
    %312 = arith.mulf %305, %311 : vector<2x64xf32>
    %313 = vector.extract_strided_slice %312 {offsets = [0, 0], sizes = [2, 32], strides = [1, 1]} : vector<2x64xf32> to vector<2x32xf32>
    %314 = vector.extract_strided_slice %312 {offsets = [0, 32], sizes = [2, 32], strides = [1, 1]} : vector<2x64xf32> to vector<2x32xf32>
    %315 = arith.addf %313, %314 : vector<2x32xf32>
    %c0_56 = arith.constant 0 : index
    %c0_57 = arith.constant 0 : index
    %316 = vector.load %arg6[%c0_56, %c0_57] : memref<1x32xf32, #tpu.memory_space<vmem>>, vector<1x32xf32>
    %317 = vector.broadcast %316 : vector<1x32xf32> to vector<2x32xf32>
    %318 = arith.mulf %315, %317 : vector<2x32xf32>
    %cst_58 = arith.constant dense<0.000000e+00> : vector<2xf32>
    %319 = vector.multi_reduction <add>, %318, %cst_58 [1] : vector<2x32xf32> to vector<2xf32>
    %320 = vector.shape_cast %319 : vector<2xf32> to vector<2x1xf32>
    %c0_59 = arith.constant 0 : index
    %c0_60 = arith.constant 0 : index
    %321 = vector.load %arg7[%c0_59, %c0_60] : memref<1x1xf32, #tpu.memory_space<vmem>>, vector<1x1xf32>
    %322 = vector.broadcast %321 : vector<1x1xf32> to vector<2x1xf32>
    %323 = arith.addf %320, %322 : vector<2x1xf32>
    %c0_61 = arith.constant 0 : index
    %c0_62 = arith.constant 0 : index
    %324 = vector.load %arg8[%c0_61, %c0_62] : memref<2x16xf32, #tpu.memory_space<vmem>>, vector<1x16xf32>
    %325 = vector.broadcast %323 : vector<2x1xf32> to vector<2x16xf32>
    %326 = vector.broadcast %324 : vector<1x16xf32> to vector<2x16xf32>
    %327 = arith.mulf %325, %326 : vector<2x16xf32>
    %c0_63 = arith.constant 0 : index
    %c0_64 = arith.constant 0 : index
    %328 = vector.load %arg1[%c0_63, %c0_64] : memref<2x1xf32, #tpu.memory_space<vmem>>, vector<2x1xf32>
    %c1_65 = arith.constant 1 : index
    %c0_66 = arith.constant 0 : index
    %329 = vector.load %arg8[%c1_65, %c0_66] : memref<2x16xf32, #tpu.memory_space<vmem>>, vector<1x16xf32>
    %330 = vector.broadcast %328 : vector<2x1xf32> to vector<2x16xf32>
    %331 = vector.broadcast %329 : vector<1x16xf32> to vector<2x16xf32>
    %332 = arith.mulf %330, %331 : vector<2x16xf32>
    %333 = arith.addf %327, %332 : vector<2x16xf32>
    %c0_67 = arith.constant 0 : index
    %c0_68 = arith.constant 0 : index
    %334 = vector.load %arg9[%c0_67, %c0_68] : memref<1x16xf32, #tpu.memory_space<vmem>>, vector<1x16xf32>
    %335 = vector.broadcast %334 : vector<1x16xf32> to vector<2x16xf32>
    %336 = arith.addf %333, %335 : vector<2x16xf32>
    %c0_69 = arith.constant 0 : index
    %c0_70 = arith.constant 0 : index
    %337 = vector.load %arg10[%c0_69, %c0_70] : memref<1x16xf32, #tpu.memory_space<vmem>>, vector<1x16xf32>
    %338 = vector.broadcast %337 : vector<1x16xf32> to vector<2x16xf32>
    %339 = arith.mulf %336, %338 : vector<2x16xf32>
    %cst_71 = arith.constant dense<0.000000e+00> : vector<2xf32>
    %340 = vector.multi_reduction <add>, %339, %cst_71 [1] : vector<2x16xf32> to vector<2xf32>
    %341 = vector.shape_cast %340 : vector<2xf32> to vector<2x1xf32>
    %c0_72 = arith.constant 0 : index
    %c0_73 = arith.constant 0 : index
    %342 = vector.load %arg11[%c0_72, %c0_73] : memref<1x1xf32, #tpu.memory_space<vmem>>, vector<1x1xf32>
    %343 = vector.broadcast %342 : vector<1x1xf32> to vector<2x1xf32>
    %344 = arith.addf %341, %343 : vector<2x1xf32>
    %c0_74 = arith.constant 0 : index
    %c0_75 = arith.constant 0 : index
    %345 = vector.load %arg12[%c0_74, %c0_75] : memref<2x1xf32, #tpu.memory_space<vmem>>, vector<2x1xf32>
    tpu.vector_store %arg12[%c0_74, %c0_75], %344 {strides = array<i32>} : memref<2x1xf32, #tpu.memory_space<vmem>>, vector<2x1xf32>,
    return
  }
}

</mosaic_0001>

<bundles_post_ra>
// kernel: esm_lstm_forward.1
= control target key start
LH: loop header
LB: loop body
LE: loop exit
PB: predicated region body
PF: predicated region fallthrough
CT: control target
= control target key end

     0   :  { %v2447_v3 = vmov 0.0   ;;  %vm120_vm0 = vcmask 64512   ;;  %vm122_vm1 = vcmask 588800   ;;  %v97_v29 = vlaneseq  ;;  %s2450_s17 = smov 96   ;;  %s3176_s2 = inlined_call_operand.vmem [shape: f32[72,256], index: 2, kind: input, shape index: {}]   ;;  %s3177_s0 = inlined_call_operand.vmem [shape: f32[8,2,8], index: 0, kind: input, shape index: {}]   ;;  %s3178_s3 = inlined_call_operand.vmem [shape: f32[1,256], index: 3, kind: input, shape index: {}]   ;;  %s3179_s4 = inlined_call_operand.vmem [shape: f32[128,256], index: 4, kind: input, shape index: {}]   ;;  %s3180_s5 = inlined_call_operand.vmem [shape: f32[1,256], index: 5, kind: input, shape index: {}]   ;;  %s3181_s6 = inlined_call_operand.vmem [shape: f32[1,32], index: 6, kind: input, shape index: {}]   ;;  %s3182_s7 = inlined_call_operand.<no memory space> [shape: f32[1,1], index: 7, kind: input, shape index: {}]   ;;  %s3183_s1 = inlined_call_operand.vmem [shape: f32[2,1], index: 1, kind: input, shape index: {}]   ;;  %s3184_s11 = inlined_call_operand.<no memory space> [shape: f32[1,1], index: 11, kind: input, shape index: {}]   ;;  %s3185_s8 = inlined_call_operand.vmem [shape: f32[2,16], index: 8, kind: input, shape index: {}]   ;;  %s3186_s9 = inlined_call_operand.vmem [shape: f32[1,16], index: 9, kind: input, shape index: {}]   ;;  %s3187_s10 = inlined_call_operand.vmem [shape: f32[1,16], index: 10, kind: input, shape index: {}]   ;;  %s3188_s12 = inlined_call_operand.vmem [shape: f32[2,1], index: 12, kind: output, shape index: {}]  }
   0x1   :  { %v46_v0 = vld [vmem:[%s3176_s2 + $0x8] sm:$0xff]  ;;  %v48_v1 = vld [vmem:[%s3176_s2 + $0x18] sm:$0xff]  ;;  %v45_v2 = vld [vmem:[%s3176_s2] sm:$0xff]  ;;  %190 = vmatprep.mubr.f32.mxu0 %v2447_v3  ;;  %289 = vmatprep.mubr.f32.mxu1 %v2447_v3  ;;  %vm223_vm2 = vcmask 523264   ;;  %vm1737_vm3 = vcmask 254976   ;;  %vm1789_vm4 = vcmask 123904  }
   0x2   :  { %v2528_v4 = vpack.c.bf16 %v48_v1, %v46_v0  ;;  %v47_v5 = vld [vmem:[%s3176_s2 + $0x10] sm:$0xff]  ;;  %v50_v6 = vld [vmem:[%s3176_s2 + $0x28] sm:$0xff]  ;;  %v52_v7 = vld [vmem:[%s3176_s2 + $0x38] sm:$0xff]  ;;  %v2620_v30 = vshrl.u32 %v97_v29, 7  ;;  %vm1801_vm5 = vcmask 1024  }
   0x3   :  { %v2539_v8 = vpack.c.bf16 %v47_v5, %v45_v2  ;;  %v2541_v9 = vpack.c.bf16 %v52_v7, %v50_v6  ;;  %v49_v10 = vld [vmem:[%s3176_s2 + $0x20] sm:$0xff]  ;;  %v51_v11 = vld [vmem:[%s3176_s2 + $0x30] sm:$0xff]  ;;  %v54_v12 = vld [vmem:[%s3176_s2 + $0x48] sm:$0xff] }
   0x4   :  { %1863 = vmatprep.subr.bf16.mxu0 %v2528_v4  ;;  %v56_v13 = vld [vmem:[%s3176_s2 + $0x58] sm:$0xff]  ;;  %v2557_v14 = vpack.c.bf16 %v51_v11, %v49_v10  ;;  %v53_v16 = vld [vmem:[%s3176_s2 + $0x40] sm:$0xff]  ;;  %v55_v17 = vld [vmem:[%s3176_s2 + $0x50] sm:$0xff]  ;;  %v99_v31 = vsub.s32 0, %v2620_v30  ;;  %v103_v38 = vsub.s32 1, %v2620_v30 }
   0x5   :  { %1865 = vmatpush1.bf16.msra.mxu0 %v2539_v8  ;;  %v2560_v15 = vpack.c.bf16 %v56_v13, %v54_v12  ;;  %v58_v18 = vld [vmem:[%s3176_s2 + $0x68] sm:$0xff]  ;;  %v60_v19 = vld [vmem:[%s3176_s2 + $0x78] sm:$0xff]  ;;  %v2575_v20 = vpack.c.bf16 %v55_v17, %v53_v16  ;;  %v57_v22 = vld [vmem:[%s3176_s2 + $0x60] sm:$0xff] }
   0x6   :  { %1867 = vmatprep.subr.bf16.mxu0 %v2541_v9  ;;  %v2578_v21 = vpack.c.bf16 %v60_v19, %v58_v18  ;;  %v59_v23 = vld [vmem:[%s3176_s2 + $0x70] sm:$0xff]  ;;  %v2593_v25 = vld [vmem:[%s3176_s2 + $0x88] sm:$0xff]  ;;  %v119_v26 = vld [vmem:[%s3177_s0] sm:$0x3] }
   0x7   :  { %v2587_v24 = vpack.c.bf16 %v59_v23, %v57_v22  ;;  %v2603_v27 = vld [vmem:[%s3176_s2 + $0x80] sm:$0xff]  ;;  %v121_v28 = vsel %vm120_vm0, %v119_v26, 0.0  ;;  %v64_v46 = vld [vmem:[%s3179_s4 + $0x8] sm:$0xff]  ;;  %v66_v47 = vld [vmem:[%s3179_s4 + $0x18] sm:$0xff] }
   0x8   :  { %v95_v32 = vld [vmem:[%s3178_s3] sm:$0x3]  ;;  %s2448_s3 = smov 64   ;;  %v2653_v49 = vpack.c.bf16 %v66_v47, %v64_v46  ;;  %v65_v50 = vld [vmem:[%s3179_s4 + $0x10] sm:$0xff]  ;;  %v68_v51 = vld [vmem:[%s3179_s4 + $0x28] sm:$0xff] }
   0x9   :  { %1869 = vmatpush1.bf16.msra.mxu0 %v2557_v14  ;;  %v2628_v33 = vrot.slane %v95_v32, %v99_v31  ;;  %v2634_v39 = vrot.slane %v95_v32, %v103_v38  ;;  %v63_v48 = vld [vmem:[%s3179_s4] sm:$0xff]  ;;  %v70_v52 = vld [vmem:[%s3179_s4 + $0x38] sm:$0xff]  ;;  %v69_v56 = vld [vmem:[%s3179_s4 + $0x30] sm:$0xff] }
   0xa   :  { %1871 = vmatprep.subr.bf16.mxu0 %v2560_v15  ;;  %v2664_v53 = vpack.c.bf16 %v65_v50, %v63_v48  ;;  %v2666_v54 = vpack.c.bf16 %v70_v52, %v68_v51  ;;  %v67_v55 = vld [vmem:[%s3179_s4 + $0x20] sm:$0xff]  ;;  %v72_v57 = vld [vmem:[%s3179_s4 + $0x48] sm:$0xff]  ;;  %1879 = vmatprep.subr.bf16.mxu1 %v2653_v49  ;;  %v74_v58 = vld [vmem:[%s3179_s4 + $0x58] sm:$0xff] }
   0xb   :  { %v2682_v59 = vpack.c.bf16 %v69_v56, %v67_v55  ;;  %v2685_v60 = vpack.c.bf16 %v74_v58, %v72_v57  ;;  %v71_v61 = vld [vmem:[%s3179_s4 + $0x40] sm:$0xff]  ;;  %v73_v62 = vld [vmem:[%s3179_s4 + $0x50] sm:$0xff]  ;;  %v76_v63 = vld [vmem:[%s3179_s4 + $0x68] sm:$0xff] }
   0xc   :  { %1881 = vmatpush1.bf16.msra.mxu1 %v2664_v53  ;;  %v78_v0 = vld [vmem:[%s3179_s4 + $0x78] sm:$0xff]  ;;  %v2700_v1 = vpack.c.bf16 %v73_v62, %v71_v61  ;;  %v75_v5 = vld [vmem:[%s3179_s4 + $0x60] sm:$0xff]  ;;  %v77_v6 = vld [vmem:[%s3179_s4 + $0x70] sm:$0xff] }
   0xd   :  { %1873 = vmatpush1.bf16.msra.mxu0 %v2575_v20  ;;  %1883 = vmatprep.subr.bf16.mxu1 %v2666_v54  ;;  %v2703_v2 = vpack.c.bf16 %v78_v0, %v76_v63  ;;  %v80_v7 = vld [vmem:[%s3179_s4 + $0x88] sm:$0xff]  ;;  %v82_v10 = vld [vmem:[%s3179_s4 + $0x98] sm:$0xff]  ;;  %v2718_v11 = vpack.c.bf16 %v77_v6, %v75_v5  ;;  %v79_v13 = vld [vmem:[%s3179_s4 + $0x80] sm:$0xff] }
   0xe   :  { %1875 = vmatprep.subr.bf16.mxu0 %v2578_v21  ;;  %v2721_v12 = vpack.c.bf16 %v82_v10, %v80_v7  ;;  %v81_v16 = vld [vmem:[%s3179_s4 + $0x90] sm:$0xff]  ;;  %v84_v17 = vld [vmem:[%s3179_s4 + $0xa8] sm:$0xff]  ;;  %v86_v18 = vld [vmem:[%s3179_s4 + $0xb8] sm:$0xff] }
   0xf   :  { %v2736_v19 = vpack.c.bf16 %v81_v16, %v79_v13  ;;  %v2739_v22 = vpack.c.bf16 %v86_v18, %v84_v17  ;;  %v83_v23 = vld [vmem:[%s3179_s4 + $0xa0] sm:$0xff]  ;;  %v85_v26 = vld [vmem:[%s3179_s4 + $0xb0] sm:$0xff]  ;;  %v90_v29 = vld [vmem:[%s3179_s4 + $0xd8] sm:$0xff] }
  0x10   :  { %1885 = vmatpush1.bf16.msra.mxu1 %v2682_v59  ;;  %v2754_v32 = vpack.c.bf16 %v85_v26, %v83_v23  ;;  %v93_v46 = vld [vmem:[%s3179_s4 + $0xf0] sm:$0xff]  ;;  %v107_v0 = vld [vmem:[%s3180_s5] sm:$0x3] }
  0x11   :  { %1877 = vmatpush1.bf16.msra.mxu0 %v2587_v24  ;;  %1887 = vmatprep.subr.bf16.mxu1 %v2685_v60  ;;  %v2835_v5 = vrot.slane %v107_v0, %v99_v31  ;;  %v2841_v26 = vrot.slane %v107_v0, %v103_v38 }
  0x12   :  { %142 = vmatprep.subr.mxu0 %v2593_v25 }
  0x14   :  { %1889 = vmatpush1.bf16.msra.mxu1 %v2700_v1 }
  0x15   :  { %143 = vmatpush1.msra.mxu0 %v2603_v27  ;;  %1891 = vmatprep.subr.bf16.mxu1 %v2703_v2 }
  0x16   :  { %1807 = vmatmul.mubr.msk.f32.vlgmr.msra.gmra.mrb[0].mxu0 %vm122_vm1, %v121_v28  ;;  %1911 = vmatprep.subr.bf16.mxu0 %v2528_v4  ;;  %v88_v28 = vld [vmem:[%s3179_s4 + $0xc8] sm:$0xff] }
  0x17   :  { %1913 = vmatpush1.bf16.msra.mxu0 %v2539_v8  ;;  %391 = vmatprep.mubr.f32.mxu0 %v2447_v3 }
  0x18   :  { %1915 = vmatprep.subr.bf16.mxu0 %v2541_v9  ;;  %1893 = vmatpush1.bf16.msra.mxu1 %v2718_v11 }
  0x19   :  { %1895 = vmatprep.subr.bf16.mxu1 %v2721_v12 }
  0x1b   :  { %1917 = vmatpush1.bf16.msra.mxu0 %v2557_v14 }
  0x1c   :  { %1919 = vmatprep.subr.bf16.mxu0 %v2560_v15  ;;  %1897 = vmatpush1.bf16.msra.mxu1 %v2736_v19 }
  0x1d   :  { %1899 = vmatprep.subr.bf16.mxu1 %v2739_v22 }
  0x1f   :  { %1921 = vmatpush1.bf16.msra.mxu0 %v2575_v20 }
  0x20   :  { %1923 = vmatprep.subr.bf16.mxu0 %v2578_v21  ;;  %1901 = vmatpush1.bf16.msra.mxu1 %v2754_v32 }
  0x23   :  { %1925 = vmatpush1.bf16.msra.mxu0 %v2587_v24 }
  0x24   :  { %343 = vmatprep.subr.mxu0 %v2593_v25 }
  0x27   :  { %344 = vmatpush1.msra.mxu0 %v2603_v27 }
  0x28   :  { %1959 = vmatprep.subr.bf16.mxu0 %v2528_v4 }
  0xe9   :  { %v192_v34 = vpop.f32.mrb[0].mxu0 }
  0xea   :  { %v193_v35 = vadd.f32 %v192_v34, %v2628_v33  ;;  %v194_v36 = vpop.f32.mrb[1].mxu0  ;;  %v2757_v34 = vpack.c.bf16 %v90_v29, %v88_v28 }
  0xeb   :  { %v2637_v40 = vadd.f32 %v194_v36, %v2634_v39  ;;  %v89_v36 = vld [vmem:[%s3179_s4 + $0xd0] sm:$0xff] }
  0xec   :  { %v1808_v37 = vmul.f32 -1.442695, %v193_v35  ;;  %v87_v35 = vld [vmem:[%s3179_s4 + $0xc0] sm:$0xff]  ;;  %1903 = vmatprep.subr.bf16.mxu1 %v2757_v34 }
  0xed   :  { %v1809_v48 = vmul.f32 -1.442695, %v2637_v40 }
  0xee   :  { %2253 = vpow2.f32 %v1808_v37  ;;  %v92_v37 = vld [vmem:[%s3179_s4 + $0xe8] sm:$0xff] }
  0xef   :  { %2255 = vtanh.f32 %v2637_v40  ;;  %v1813_v40 = vld [vmem:[%s3177_s0 + $0x2] sm:$0x3] }
  0xf8   :  { %v2254_v41 = vpop.eup %2253 }
  0xf9   :  { %v203_v42 = vadd.f32 1.0, %v2254_v41  ;;  %v2256_v43 = vpop.eup %2255  ;;  %v94_v41 = vld [vmem:[%s3179_s4 + $0xf8] sm:$0xff] }
  0xfb   :  { %2257 = vrcp.f32 %v203_v42  ;;  %v2772_v42 = vpack.c.bf16 %v89_v36, %v87_v35 }
  0xfc   :  { %2259 = vpow2.f32 %v1809_v48 }
  0xfd   :  { %1905 = vmatpush1.bf16.msra.mxu1 %v2772_v42 }
 0x105   :  { %v2640_v44 = vpop.eup %2257 }
 0x106   :  { %v211_v45 = vmul.f32 %v2640_v44, %v2256_v43  ;;  %v2775_v43 = vpack.c.bf16 %v94_v41, %v92_v37  ;;  %v2260_v50 = vpop.eup %2259  ;;  %v210_v52 = vmul.f32 0.0, %v2640_v44 }
 0x107   :  { %v204_v51 = vadd.f32 1.0, %v2260_v50 }
 0x108   :  { %213 = vrot.lane.b32.xlu0 %v211_v45, %s2448_s3  ;;  %v91_v45 = vld [vmem:[%s3179_s4 + $0xe0] sm:$0xff]  ;;  %1907 = vmatprep.subr.bf16.mxu1 %v2775_v43  ;;  %s2449_s4 = smov 72  }
 0x109   :  { %v2784_v47 = vpack.c.bf16 %v93_v46, %v91_v45  ;;  %2261 = vrcp.f32 %v204_v51 }
 0x10b   :  { %1909 = vmatpush1.bf16.msra.mxu1 %v2784_v47 }
 0x10c   :  { %1927 = vmatprep.subr.bf16.mxu1 %v2653_v49 }
 0x113   :  { %v2262_v57 = vpop.eup %2261 }
 0x17a   :  { %v214_v55 = vpop.permute.xlu0 %213 }
 0x17b   :  { %v2791_v56 = vadd.f32 %v214_v55, %v210_v52 }
 0x17d   :  { %2263 = vtanh.f32 %v2791_v56 }
 0x187   :  { %v2264_v58 = vpop.eup %2263 }
 0x188   :  { %v218_v61 = vmul.f32 %v2264_v58, %v2262_v57 }
 0x18a   :  { %220 = vrot.lane.b32.xlu1 %v218_v61, %s2448_s3  ;;  %320 = vrot.lane.b32.xlu0 %v218_v61, %s2449_s4 }
 0x1fc   :  { %v221_v44 = vpop.permute.xlu1 %220  ;;  %v321_v62 = vpop.permute.xlu0 %320 }
 0x1fd   :  { %v323_v63 = vsel %vm120_vm0, %v1813_v40, %v321_v62  ;;  %1810 = vmatmul.mubr.msk.f32.vlgmr.msra.gmra.mrb[0].mxu1 %vm223_vm2, %v221_v44 }
 0x1fe   :  { %1814 = vmatmul.mubr.msk.f32.vlgmr.msra.gmra.mrb[2].mxu0 %vm122_vm1, %v323_v63  ;;  %1929 = vmatpush1.bf16.msra.mxu1 %v2664_v53 }
 0x1ff   :  { %1931 = vmatprep.subr.bf16.mxu1 %v2666_v54  ;;  %1961 = vmatpush1.bf16.msra.mxu0 %v2539_v8 }
 0x200   :  { %1963 = vmatprep.subr.bf16.mxu0 %v2541_v9  ;;  %591 = vmatprep.mubr.f32.mxu0 %v2447_v3 }
 0x201   :  { %489 = vmatprep.mubr.f32.mxu1 %v2447_v3 }
 0x202   :  { %1933 = vmatpush1.bf16.msra.mxu1 %v2682_v59 }
 0x203   :  { %1935 = vmatprep.subr.bf16.mxu1 %v2685_v60  ;;  %1965 = vmatpush1.bf16.msra.mxu0 %v2557_v14 }
 0x204   :  { %1967 = vmatprep.subr.bf16.mxu0 %v2560_v15 }
 0x206   :  { %1937 = vmatpush1.bf16.msra.mxu1 %v2700_v1 }
 0x207   :  { %1939 = vmatprep.subr.bf16.mxu1 %v2703_v2  ;;  %1969 = vmatpush1.bf16.msra.mxu0 %v2575_v20 }
 0x208   :  { %1971 = vmatprep.subr.bf16.mxu0 %v2578_v21 }
 0x20a   :  { %1941 = vmatpush1.bf16.msra.mxu1 %v2718_v11 }
 0x20b   :  { %1943 = vmatprep.subr.bf16.mxu1 %v2721_v12  ;;  %1973 = vmatpush1.bf16.msra.mxu0 %v2587_v24 }
 0x20c   :  { %543 = vmatprep.subr.mxu0 %v2593_v25 }
 0x20e   :  { %1945 = vmatpush1.bf16.msra.mxu1 %v2736_v19 }
 0x20f   :  { %1947 = vmatprep.subr.bf16.mxu1 %v2739_v22  ;;  %544 = vmatpush1.msra.mxu0 %v2603_v27 }
 0x210   :  { %1975 = vmatprep.subr.bf16.mxu0 %v2653_v49 }
 0x212   :  { %1949 = vmatpush1.bf16.msra.mxu1 %v2754_v32 }
 0x213   :  { %1951 = vmatprep.subr.bf16.mxu1 %v2757_v34 }
 0x216   :  { %1953 = vmatpush1.bf16.msra.mxu1 %v2772_v42 }
 0x217   :  { %1955 = vmatprep.subr.bf16.mxu1 %v2775_v43 }
 0x21a   :  { %1957 = vmatpush1.bf16.msra.mxu1 %v2784_v47 }
 0x21b   :  { %2023 = vmatprep.subr.bf16.mxu1 %v2653_v49 }
 0x2d0   :  { %v291_v6 = vpop.f32.mrb[0].mxu1 }
 0x2d1   :  { %v292_v7 = vadd.f32 %v291_v6, %v2835_v5  ;;  %v293_v10 = vpop.f32.mrb[1].mxu1  ;;  %v393_v13 = vpop.f32.mrb[2].mxu0 }
 0x2d2   :  { %v394_v16 = vadd.f32 %v393_v13, %v2628_v33  ;;  %v395_v17 = vpop.f32.mrb[3].mxu0  ;;  %v294_v28 = vadd.f32 %v293_v10, %v2841_v26  ;;  %v1819_v10 = vld [vmem:[%s3177_s0 + $0x4] sm:$0x3] }
 0x2d3   :  { %v1811_v18 = vmul.f32 -1.442695, %v292_v7  ;;  %v396_v29 = vadd.f32 %v395_v17, %v2634_v39 }
 0x2d4   :  { %v1815_v23 = vmul.f32 -1.442695, %v394_v16  ;;  %v1812_v62 = vmul.f32 -1.442695, %v294_v28 }
 0x2d5   :  { %2265 = vpow2.f32 %v1811_v18  ;;  %v1816_v38 = vmul.f32 -1.442695, %v396_v29 }
 0x2d6   :  { %2267 = vpow2.f32 %v1815_v23 }
 0x2d7   :  { %2269 = vtanh.f32 %v294_v28 }
 0x2df   :  { %v2266_v31 = vpop.eup %2265 }
 0x2e0   :  { %v302_v35 = vadd.f32 1.0, %v2266_v31  ;;  %v2268_v36 = vpop.eup %2267 }
 0x2e1   :  { %v404_v37 = vadd.f32 1.0, %v2268_v36  ;;  %v2270_v41 = vpop.eup %2269 }
 0x2e2   :  { %2271 = vrcp.f32 %v302_v35 }
 0x2e3   :  { %2273 = vtanh.f32 %v396_v29 }
 0x2e4   :  { %2275 = vrcp.f32 %v404_v37 }
 0x2e5   :  { %2277 = vpow2.f32 %v1816_v38 }
 0x2ec   :  { %v2272_v45 = vpop.eup %2271 }
 0x2ed   :  { %v2274_v46 = vpop.eup %2273  ;;  %v310_v48 = vmul.f32 %v2272_v45, %v2270_v41  ;;  %v309_v0 = vmul.f32 0.0, %v2272_v45 }
 0x2ee   :  { %v2276_v50 = vpop.eup %2275 }
 0x2ef   :  { %v412_v30 = vmul.f32 %v2276_v50, %v2274_v46  ;;  %v2278_v51 = vpop.eup %2277  ;;  %v411_v55 = vmul.f32 %v2276_v50, %v2791_v56 }
 0x2f0   :  { %v405_v52 = vadd.f32 1.0, %v2278_v51 }
 0x2f1   :  { %414 = vrot.lane.b32.xlu1 %v412_v30, %s2448_s3 }
 0x2f2   :  { %2279 = vrcp.f32 %v405_v52 }
 0x2f5   :  { %312 = vrot.lane.b32.xlu1 %v310_v48, %s2448_s3 }
 0x2fc   :  { %v2280_v61 = vpop.eup %2279 }
 0x363   :  { %v415_v57 = vpop.permute.xlu1 %414 }
 0x364   :  { %v2848_v58 = vadd.f32 %v415_v57, %v411_v55 }
 0x366   :  { %2281 = vtanh.f32 %v2848_v58 }
 0x367   :  { %2283 = vpow2.f32 %v1812_v62  ;;  %v313_v63 = vpop.permute.xlu1 %312 }
 0x368   :  { %v2853_v7 = vadd.f32 %v313_v63, %v309_v0 }
 0x36a   :  { %2285 = vtanh.f32 %v2853_v7 }
 0x370   :  { %v2282_v40 = vpop.eup %2281 }
 0x371   :  { %v419_v44 = vmul.f32 %v2282_v40, %v2280_v61  ;;  %v2284_v6 = vpop.eup %2283 }
 0x372   :  { %v303_v56 = vadd.f32 1.0, %v2284_v6 }
 0x373   :  { %520 = vrot.lane.b32.xlu0 %v419_v44, %s2449_s4 }
 0x374   :  { %2287 = vrcp.f32 %v303_v56  ;;  %v2286_v13 = vpop.eup %2285 }
 0x377   :  { %421 = vrot.lane.b32.xlu0 %v419_v44, %s2448_s3 }
 0x37e   :  { %v2288_v18 = vpop.eup %2287 }
 0x37f   :  { %v317_v23 = vmul.f32 %v2288_v18, %v2286_v13 }
 0x3e5   :  { %v521_v16 = vpop.permute.xlu0 %520 }
 0x3e6   :  { %v523_v17 = vsel %vm120_vm0, %v1819_v10, %v521_v16 }
 0x3e7   :  { %1820 = vmatmul.mubr.msk.f32.vlgmr.msra.gmra.mrb[4].mxu0 %vm122_vm1, %v523_v17 }
 0x3e8   :  { %1977 = vmatpush1.bf16.msra.mxu0 %v2664_v53  ;;  %689 = vmatprep.mubr.f32.mxu0 %v2447_v3 }
 0x3e9   :  { %v422_v28 = vpop.permute.xlu0 %421  ;;  %1979 = vmatprep.subr.bf16.mxu0 %v2666_v54 }
 0x3ea   :  { %v424_v31 = vsel %vm223_vm2, %v422_v28, %v317_v23 }
 0x3eb   :  { %490 = vmatmul.mubr.f32.vlgmr.msra.gmra.mrb[2].mxu1 %v424_v31 }
 0x3ec   :  { %1981 = vmatpush1.bf16.msra.mxu0 %v2682_v59  ;;  %2025 = vmatpush1.bf16.msra.mxu1 %v2664_v53 }
 0x3ed   :  { %1983 = vmatprep.subr.bf16.mxu0 %v2685_v60  ;;  %2027 = vmatprep.subr.bf16.mxu1 %v2666_v54 }
 0x3ee   :  { %889 = vmatprep.mubr.f32.mxu1 %v2447_v3 }
 0x3f0   :  { %1985 = vmatpush1.bf16.msra.mxu0 %v2700_v1  ;;  %2029 = vmatpush1.bf16.msra.mxu1 %v2682_v59 }
 0x3f1   :  { %1987 = vmatprep.subr.bf16.mxu0 %v2703_v2  ;;  %2031 = vmatprep.subr.bf16.mxu1 %v2685_v60 }
 0x3f4   :  { %1989 = vmatpush1.bf16.msra.mxu0 %v2718_v11  ;;  %2033 = vmatpush1.bf16.msra.mxu1 %v2700_v1 }
 0x3f5   :  { %1991 = vmatprep.subr.bf16.mxu0 %v2721_v12  ;;  %2035 = vmatprep.subr.bf16.mxu1 %v2703_v2 }
 0x3f8   :  { %1993 = vmatpush1.bf16.msra.mxu0 %v2736_v19  ;;  %2037 = vmatpush1.bf16.msra.mxu1 %v2718_v11 }
 0x3f9   :  { %1995 = vmatprep.subr.bf16.mxu0 %v2739_v22  ;;  %2039 = vmatprep.subr.bf16.mxu1 %v2721_v12 }
 0x3fc   :  { %1997 = vmatpush1.bf16.msra.mxu0 %v2754_v32  ;;  %2041 = vmatpush1.bf16.msra.mxu1 %v2736_v19 }
 0x3fd   :  { %1999 = vmatprep.subr.bf16.mxu0 %v2757_v34  ;;  %2043 = vmatprep.subr.bf16.mxu1 %v2739_v22 }
 0x400   :  { %2001 = vmatpush1.bf16.msra.mxu0 %v2772_v42  ;;  %2045 = vmatpush1.bf16.msra.mxu1 %v2754_v32 }
 0x401   :  { %2003 = vmatprep.subr.bf16.mxu0 %v2775_v43  ;;  %2047 = vmatprep.subr.bf16.mxu1 %v2757_v34 }
 0x404   :  { %2005 = vmatpush1.bf16.msra.mxu0 %v2784_v47  ;;  %2049 = vmatpush1.bf16.msra.mxu1 %v2772_v42 }
 0x405   :  { %2007 = vmatprep.subr.bf16.mxu0 %v2528_v4  ;;  %2051 = vmatprep.subr.bf16.mxu1 %v2775_v43 }
 0x408   :  { %2053 = vmatpush1.bf16.msra.mxu1 %v2784_v47 }
 0x409   :  { %2103 = vmatprep.subr.bf16.mxu1 %v2528_v4 }
 0x4ba   :  { %v593_v29 = vpop.f32.mrb[4].mxu0 }
 0x4bb   :  { %v594_v35 = vadd.f32 %v593_v29, %v2628_v33  ;;  %v595_v36 = vpop.f32.mrb[5].mxu0 }
 0x4bc   :  { %v596_v50 = vadd.f32 %v595_v36, %v2634_v39 }
 0x4bd   :  { %v1821_v37 = vmul.f32 -1.442695, %v594_v35 }
 0x4be   :  { %v491_v41 = vpop.f32.mrb[2].mxu1  ;;  %v1822_v0 = vmul.f32 -1.442695, %v596_v50 }
 0x4bf   :  { %2289 = vpow2.f32 %v1821_v37  ;;  %v492_v45 = vadd.f32 %v491_v41, %v2835_v5  ;;  %v493_v46 = vpop.f32.mrb[3].mxu1 }
 0x4c0   :  { %v494_v51 = vadd.f32 %v493_v46, %v2841_v26 }
 0x4c1   :  { %v1817_v48 = vmul.f32 -1.442695, %v492_v45 }
 0x4c2   :  { %v1818_v28 = vmul.f32 -1.442695, %v494_v51 }
 0x4c3   :  { %2291 = vpow2.f32 %v1817_v48 }
 0x4c4   :  { %2293 = vtanh.f32 %v596_v50 }
 0x4c9   :  { %v2290_v30 = vpop.eup %2289 }
 0x4ca   :  { %v604_v38 = vadd.f32 1.0, %v2290_v30 }
 0x4cc   :  { %2295 = vrcp.f32 %v604_v38 }
 0x4cd   :  { %v2292_v52 = vpop.eup %2291  ;;  %2297 = vtanh.f32 %v494_v51 }
 0x4ce   :  { %v502_v55 = vadd.f32 1.0, %v2292_v52  ;;  %v2294_v57 = vpop.eup %2293 }
 0x4d0   :  { %2299 = vrcp.f32 %v502_v55 }
 0x4d1   :  { %2301 = vpow2.f32 %v1822_v0 }
 0x4d6   :  { %v2296_v61 = vpop.eup %2295 }
 0x4d7   :  { %v612_v40 = vmul.f32 %v2296_v61, %v2294_v57  ;;  %v2298_v44 = vpop.eup %2297  ;;  %v611_v10 = vmul.f32 %v2296_v61, %v2848_v58 }
 0x4d9   :  { %614 = vrot.lane.b32.xlu1 %v612_v40, %s2448_s3 }
 0x4da   :  { %v2300_v62 = vpop.eup %2299 }
 0x4db   :  { %v510_v63 = vmul.f32 %v2300_v62, %v2298_v44  ;;  %v2302_v6 = vpop.eup %2301  ;;  %v509_v29 = vmul.f32 %v2300_v62, %v2853_v7  ;;  %v1825_v7 = vld [vmem:[%s3177_s0 + $0x6] sm:$0x3] }
 0x4dc   :  { %v605_v56 = vadd.f32 1.0, %v2302_v6 }
 0x4dd   :  { %512 = vrot.lane.b32.xlu0 %v510_v63, %s2448_s3 }
 0x4de   :  { %2303 = vrcp.f32 %v605_v56 }
 0x4e8   :  { %v2304_v17 = vpop.eup %2303 }
 0x54b   :  { %v615_v13 = vpop.permute.xlu1 %614 }
 0x54c   :  { %v2903_v16 = vadd.f32 %v615_v13, %v611_v10 }
 0x54e   :  { %2305 = vtanh.f32 %v2903_v16 }
 0x54f   :  { %2307 = vpow2.f32 %v1818_v28  ;;  %v513_v31 = vpop.permute.xlu0 %512 }
 0x550   :  { %v2909_v58 = vadd.f32 %v513_v31, %v509_v29 }
 0x552   :  { %2309 = vtanh.f32 %v2909_v58 }
 0x558   :  { %v2306_v18 = vpop.eup %2305 }
 0x559   :  { %v619_v23 = vmul.f32 %v2306_v18, %v2304_v17  ;;  %v2308_v35 = vpop.eup %2307 }
 0x55a   :  { %v503_v36 = vadd.f32 1.0, %v2308_v35 }
 0x55b   :  { %621 = vrot.lane.b32.xlu1 %v619_v23, %s2448_s3  ;;  %720 = vrot.lane.b32.xlu0 %v619_v23, %s2449_s4 }
 0x55c   :  { %2311 = vrcp.f32 %v503_v36  ;;  %v2310_v37 = vpop.eup %2309 }
 0x566   :  { %v2312_v41 = vpop.eup %2311 }
 0x567   :  { %v517_v45 = vmul.f32 %v2312_v41, %v2310_v37 }
 0x5cd   :  { %v622_v46 = vpop.permute.xlu1 %621  ;;  %v721_v50 = vpop.permute.xlu0 %720 }
 0x5ce   :  { %v624_v48 = vsel %vm223_vm2, %v622_v46, %v517_v45  ;;  %v723_v30 = vsel %vm120_vm0, %v1825_v7, %v721_v50 }
 0x5cf   :  { %690 = vmatmul.mubr.f32.vlgmr.msra.gmra.mrb[6].mxu0 %v624_v48 }
 0x5d0   :  { %2009 = vmatpush1.bf16.msra.mxu0 %v2539_v8  ;;  %791 = vmatprep.mubr.f32.mxu0 %v2447_v3 }
 0x5d1   :  { %2011 = vmatprep.subr.bf16.mxu0 %v2541_v9 }
 0x5d4   :  { %2013 = vmatpush1.bf16.msra.mxu0 %v2557_v14 }
 0x5d5   :  { %2015 = vmatprep.subr.bf16.mxu0 %v2560_v15 }
 0x5d8   :  { %2017 = vmatpush1.bf16.msra.mxu0 %v2575_v20 }
 0x5d9   :  { %2019 = vmatprep.subr.bf16.mxu0 %v2578_v21 }
 0x5dc   :  { %2021 = vmatpush1.bf16.msra.mxu0 %v2587_v24 }
 0x5dd   :  { %743 = vmatprep.subr.mxu0 %v2593_v25 }
 0x5e0   :  { %744 = vmatpush1.msra.mxu0 %v2603_v27 }
 0x5e1   :  { %1826 = vmatmul.mubr.msk.f32.vlgmr.msra.gmra.mrb[8].mxu0 %vm122_vm1, %v723_v30  ;;  %2055 = vmatprep.subr.bf16.mxu0 %v2528_v4 }
 0x5e2   :  { %2057 = vmatpush1.bf16.msra.mxu0 %v2539_v8  ;;  %991 = vmatprep.mubr.f32.mxu0 %v2447_v3 }
 0x5e3   :  { %2059 = vmatprep.subr.bf16.mxu0 %v2541_v9 }
 0x5e6   :  { %2061 = vmatpush1.bf16.msra.mxu0 %v2557_v14 }
 0x5e7   :  { %2063 = vmatprep.subr.bf16.mxu0 %v2560_v15 }
 0x5ea   :  { %2065 = vmatpush1.bf16.msra.mxu0 %v2575_v20 }
 0x5eb   :  { %2067 = vmatprep.subr.bf16.mxu0 %v2578_v21 }
 0x5ee   :  { %2069 = vmatpush1.bf16.msra.mxu0 %v2587_v24 }
 0x5ef   :  { %943 = vmatprep.subr.mxu0 %v2593_v25 }
 0x5f2   :  { %944 = vmatpush1.msra.mxu0 %v2603_v27 }
 0x5f3   :  { %2071 = vmatprep.subr.bf16.mxu0 %v2653_v49 }
 0x6a2   :  { %v691_v38 = vpop.f32.mrb[6].mxu0 }
 0x6a3   :  { %v692_v51 = vadd.f32 %v691_v38, %v2835_v5  ;;  %v693_v52 = vpop.f32.mrb[7].mxu0 }
 0x6a4   :  { %v694_v57 = vadd.f32 %v693_v52, %v2841_v26 }
 0x6a5   :  { %v1823_v55 = vmul.f32 -1.442695, %v692_v51 }
 0x6a6   :  { %v1824_v50 = vmul.f32 -1.442695, %v694_v57 }
 0x6a7   :  { %2313 = vpow2.f32 %v1823_v55  ;;  %v1831_v55 = vld [vmem:[%s3177_s0 + $0x8] sm:$0x3] }
 0x6a8   :  { %2315 = vtanh.f32 %v694_v57 }
 0x6b1   :  { %v2314_v61 = vpop.eup %2313 }
 0x6b2   :  { %v702_v40 = vadd.f32 1.0, %v2314_v61  ;;  %v2316_v6 = vpop.eup %2315 }
 0x6b4   :  { %2317 = vrcp.f32 %v702_v40  ;;  %v793_v44 = vpop.f32.mrb[8].mxu0 }
 0x6b5   :  { %v794_v62 = vadd.f32 %v793_v44, %v2628_v33  ;;  %v795_v63 = vpop.f32.mrb[9].mxu0 }
 0x6b6   :  { %v796_v13 = vadd.f32 %v795_v63, %v2634_v39 }
 0x6b7   :  { %v1827_v0 = vmul.f32 -1.442695, %v794_v62 }
 0x6b8   :  { %v1828_v29 = vmul.f32 -1.442695, %v796_v13 }
 0x6b9   :  { %2319 = vpow2.f32 %v1827_v0 }
 0x6ba   :  { %2321 = vtanh.f32 %v796_v13 }
 0x6be   :  { %v2318_v56 = vpop.eup %2317 }
 0x6bf   :  { %v710_v10 = vmul.f32 %v2318_v56, %v2316_v6  ;;  %v709_v38 = vmul.f32 %v2318_v56, %v2909_v58 }
 0x6c3   :  { %v2320_v17 = vpop.eup %2319 }
 0x6c4   :  { %v804_v18 = vadd.f32 1.0, %v2320_v17  ;;  %v2322_v23 = vpop.eup %2321 }
 0x6c6   :  { %2323 = vrcp.f32 %v804_v18 }
 0x6c7   :  { %2325 = vpow2.f32 %v1828_v29 }
 0x6d0   :  { %v2324_v28 = vpop.eup %2323 }
 0x6d1   :  { %v812_v31 = vmul.f32 %v2324_v28, %v2322_v23  ;;  %v2326_v35 = vpop.eup %2325  ;;  %v811_v37 = vmul.f32 %v2324_v28, %v2903_v16 }
 0x6d2   :  { %v805_v36 = vadd.f32 1.0, %v2326_v35 }
 0x6d3   :  { %814 = vrot.lane.b32.xlu1 %v812_v31, %s2448_s3 }
 0x6d4   :  { %2327 = vrcp.f32 %v805_v36 }
 0x6d7   :  { %712 = vrot.lane.b32.xlu1 %v710_v10, %s2448_s3 }
 0x6de   :  { %v2328_v46 = vpop.eup %2327 }
 0x745   :  { %v815_v41 = vpop.permute.xlu1 %814 }
 0x746   :  { %v2947_v45 = vadd.f32 %v815_v41, %v811_v37 }
 0x748   :  { %2329 = vtanh.f32 %v2947_v45 }
 0x749   :  { %2331 = vpow2.f32 %v1824_v50  ;;  %v713_v30 = vpop.permute.xlu1 %712 }
 0x74a   :  { %v2953_v16 = vadd.f32 %v713_v30, %v709_v38 }
 0x74c   :  { %2333 = vtanh.f32 %v2953_v16 }
 0x752   :  { %v2330_v48 = vpop.eup %2329 }
 0x753   :  { %v819_v7 = vmul.f32 %v2330_v48, %v2328_v46  ;;  %v2332_v51 = vpop.eup %2331 }
 0x754   :  { %v703_v52 = vadd.f32 1.0, %v2332_v51 }
 0x755   :  { %920 = vrot.lane.b32.xlu0 %v819_v7, %s2449_s4 }
 0x756   :  { %2335 = vrcp.f32 %v703_v52  ;;  %v2334_v61 = vpop.eup %2333 }
 0x759   :  { %821 = vrot.lane.b32.xlu0 %v819_v7, %s2448_s3 }
 0x760   :  { %v2336_v57 = vpop.eup %2335 }
 0x761   :  { %v717_v62 = vmul.f32 %v2336_v57, %v2334_v61 }
 0x7c7   :  { %v921_v40 = vpop.permute.xlu0 %920 }
 0x7c8   :  { %v923_v44 = vsel %vm120_vm0, %v1831_v55, %v921_v40 }
 0x7c9   :  { %1832 = vmatmul.mubr.msk.f32.vlgmr.msra.gmra.mrb[10].mxu0 %vm122_vm1, %v923_v44 }
 0x7ca   :  { %2073 = vmatpush1.bf16.msra.mxu0 %v2664_v53  ;;  %1089 = vmatprep.mubr.f32.mxu0 %v2447_v3 }
 0x7cb   :  { %v822_v58 = vpop.permute.xlu0 %821  ;;  %2075 = vmatprep.subr.bf16.mxu0 %v2666_v54 }
 0x7cc   :  { %v824_v63 = vsel %vm223_vm2, %v822_v58, %v717_v62 }
 0x7cd   :  { %890 = vmatmul.mubr.f32.vlgmr.msra.gmra.mrb[4].mxu1 %v824_v63 }
 0x7ce   :  { %2077 = vmatpush1.bf16.msra.mxu0 %v2682_v59  ;;  %2105 = vmatpush1.bf16.msra.mxu1 %v2539_v8 }
 0x7cf   :  { %2079 = vmatprep.subr.bf16.mxu0 %v2685_v60  ;;  %2107 = vmatprep.subr.bf16.mxu1 %v2541_v9 }
 0x7d0   :  { %1191 = vmatprep.mubr.f32.mxu1 %v2447_v3 }
 0x7d2   :  { %2081 = vmatpush1.bf16.msra.mxu0 %v2700_v1  ;;  %2109 = vmatpush1.bf16.msra.mxu1 %v2557_v14 }
 0x7d3   :  { %2083 = vmatprep.subr.bf16.mxu0 %v2703_v2  ;;  %2111 = vmatprep.subr.bf16.mxu1 %v2560_v15 }
 0x7d6   :  { %2085 = vmatpush1.bf16.msra.mxu0 %v2718_v11  ;;  %2113 = vmatpush1.bf16.msra.mxu1 %v2575_v20 }
 0x7d7   :  { %2087 = vmatprep.subr.bf16.mxu0 %v2721_v12  ;;  %2115 = vmatprep.subr.bf16.mxu1 %v2578_v21 }
 0x7da   :  { %2089 = vmatpush1.bf16.msra.mxu0 %v2736_v19  ;;  %2117 = vmatpush1.bf16.msra.mxu1 %v2587_v24 }
 0x7db   :  { %2091 = vmatprep.subr.bf16.mxu0 %v2739_v22  ;;  %1143 = vmatprep.subr.mxu1 %v2593_v25 }
 0x7de   :  { %2093 = vmatpush1.bf16.msra.mxu0 %v2754_v32  ;;  %1144 = vmatpush1.msra.mxu1 %v2603_v27 }
 0x7df   :  { %2095 = vmatprep.subr.bf16.mxu0 %v2757_v34  ;;  %2119 = vmatprep.subr.bf16.mxu1 %v2653_v49 }
 0x7e2   :  { %2097 = vmatpush1.bf16.msra.mxu0 %v2772_v42 }
 0x7e3   :  { %2099 = vmatprep.subr.bf16.mxu0 %v2775_v43 }
 0x7e6   :  { %2101 = vmatpush1.bf16.msra.mxu0 %v2784_v47 }
 0x7e7   :  { %2151 = vmatprep.subr.bf16.mxu0 %v2528_v4 }
 0x89c   :  { %v993_v0 = vpop.f32.mrb[10].mxu0 }
 0x89d   :  { %v994_v6 = vadd.f32 %v993_v0, %v2628_v33  ;;  %v995_v25 = vpop.f32.mrb[11].mxu0 }
 0x89e   :  { %v996_v23 = vadd.f32 %v995_v25, %v2634_v39  ;;  %v1837_v25 = vld [vmem:[%s3177_s0 + $0xa] sm:$0x3] }
 0x89f   :  { %v1833_v56 = vmul.f32 -1.442695, %v994_v6 }
 0x8a0   :  { %v891_v10 = vpop.f32.mrb[4].mxu1  ;;  %v1834_v30 = vmul.f32 -1.442695, %v996_v23 }
 0x8a1   :  { %2337 = vpow2.f32 %v1833_v56  ;;  %v892_v13 = vadd.f32 %v891_v10, %v2835_v5  ;;  %v893_v17 = vpop.f32.mrb[5].mxu1 }
 0x8a2   :  { %v894_v29 = vadd.f32 %v893_v17, %v2841_v26 }
 0x8a3   :  { %v1829_v18 = vmul.f32 -1.442695, %v892_v13 }
 0x8a4   :  { %v1830_v62 = vmul.f32 -1.442695, %v894_v29 }
 0x8a5   :  { %2339 = vpow2.f32 %v1829_v18 }
 0x8a6   :  { %2341 = vtanh.f32 %v996_v23 }
 0x8ab   :  { %v2338_v28 = vpop.eup %2337 }
 0x8ac   :  { %v1004_v31 = vadd.f32 1.0, %v2338_v28  ;;  %v3034_v28 = vld [vmem:[%s3176_s2 + $0x88] sm:$0xff] }
 0x8ae   :  { %2343 = vrcp.f32 %v1004_v31 }
 0x8af   :  { %v2340_v35 = vpop.eup %2339  ;;  %2345 = vtanh.f32 %v894_v29 }
 0x8b0   :  { %v902_v36 = vadd.f32 1.0, %v2340_v35  ;;  %v2342_v37 = vpop.eup %2341 }
 0x8b2   :  { %2347 = vrcp.f32 %v902_v36 }
 0x8b3   :  { %2349 = vpow2.f32 %v1834_v30 }
 0x8b8   :  { %v2344_v41 = vpop.eup %2343 }
 0x8b9   :  { %v1012_v46 = vmul.f32 %v2344_v41, %v2342_v37  ;;  %v2346_v48 = vpop.eup %2345  ;;  %v1011_v52 = vmul.f32 %v2344_v41, %v2947_v45 }
 0x8bb   :  { %1014 = vrot.lane.b32.xlu1 %v1012_v46, %s2448_s3 }
 0x8bc   :  { %v2348_v7 = vpop.eup %2347 }
 0x8bd   :  { %v910_v50 = vmul.f32 %v2348_v7, %v2346_v48  ;;  %v2350_v38 = vpop.eup %2349  ;;  %v909_v63 = vmul.f32 %v2348_v7, %v2953_v16 }
 0x8be   :  { %v1005_v51 = vadd.f32 1.0, %v2350_v38 }
 0x8bf   :  { %912 = vrot.lane.b32.xlu1 %v910_v50, %s2448_s3 }
 0x8c0   :  { %2351 = vrcp.f32 %v1005_v51 }
 0x8ca   :  { %v2352_v40 = vpop.eup %2351 }
 0x92d   :  { %v1015_v55 = vpop.permute.xlu1 %1014 }
 0x92e   :  { %v2997_v61 = vadd.f32 %v1015_v55, %v1011_v52 }
 0x930   :  { %2353 = vtanh.f32 %v2997_v61 }
 0x931   :  { %2355 = vpow2.f32 %v1830_v62  ;;  %v913_v58 = vpop.permute.xlu1 %912 }
 0x932   :  { %v3003_v45 = vadd.f32 %v913_v58, %v909_v63 }
 0x934   :  { %2357 = vtanh.f32 %v3003_v45 }
 0x93a   :  { %v2354_v44 = vpop.eup %2353 }
 0x93b   :  { %v1019_v57 = vmul.f32 %v2354_v44, %v2352_v40  ;;  %v2356_v0 = vpop.eup %2355 }
 0x93c   :  { %v903_v6 = vadd.f32 1.0, %v2356_v0 }
 0x93d   :  { %1120 = vrot.lane.b32.xlu0 %v1019_v57, %s2449_s4 }
 0x93e   :  { %2359 = vrcp.f32 %v903_v6  ;;  %v2358_v56 = vpop.eup %2357 }
 0x941   :  { %1021 = vrot.lane.b32.xlu0 %v1019_v57, %s2448_s3 }
 0x948   :  { %v2360_v17 = vpop.eup %2359 }
 0x949   :  { %v917_v18 = vmul.f32 %v2360_v17, %v2358_v56 }
 0x9af   :  { %v1121_v10 = vpop.permute.xlu0 %1120 }
 0x9b0   :  { %v1123_v13 = vsel %vm120_vm0, %v1837_v25, %v1121_v10 }
 0x9b1   :  { %1838 = vmatmul.mubr.msk.f32.vlgmr.msra.gmra.mrb[6].mxu1 %vm122_vm1, %v1123_v13 }
 0x9b2   :  { %2121 = vmatpush1.bf16.msra.mxu1 %v2664_v53  ;;  %1289 = vmatprep.mubr.f32.mxu1 %v2447_v3 }
 0x9b3   :  { %v1022_v16 = vpop.permute.xlu0 %1021  ;;  %2123 = vmatprep.subr.bf16.mxu1 %v2666_v54 }
 0x9b4   :  { %v1024_v23 = vsel %vm223_vm2, %v1022_v16, %v917_v18 }
 0x9b5   :  { %1090 = vmatmul.mubr.f32.vlgmr.msra.gmra.mrb[12].mxu0 %v1024_v23 }
 0x9b6   :  { %2125 = vmatpush1.bf16.msra.mxu1 %v2682_v59  ;;  %2153 = vmatpush1.bf16.msra.mxu0 %v2539_v8 }
 0x9b7   :  { %2127 = vmatprep.subr.bf16.mxu1 %v2685_v60  ;;  %2155 = vmatprep.subr.bf16.mxu0 %v2541_v9 }
 0x9b8   :  { %1391 = vmatprep.mubr.f32.mxu0 %v2447_v3 }
 0x9ba   :  { %2129 = vmatpush1.bf16.msra.mxu1 %v2700_v1  ;;  %2157 = vmatpush1.bf16.msra.mxu0 %v2557_v14 }
 0x9bb   :  { %2131 = vmatprep.subr.bf16.mxu1 %v2703_v2  ;;  %2159 = vmatprep.subr.bf16.mxu0 %v2560_v15 }
 0x9be   :  { %2133 = vmatpush1.bf16.msra.mxu1 %v2718_v11  ;;  %2161 = vmatpush1.bf16.msra.mxu0 %v2575_v20 }
 0x9bf   :  { %2135 = vmatprep.subr.bf16.mxu1 %v2721_v12  ;;  %2163 = vmatprep.subr.bf16.mxu0 %v2578_v21 }
 0x9c2   :  { %2137 = vmatpush1.bf16.msra.mxu1 %v2736_v19  ;;  %2165 = vmatpush1.bf16.msra.mxu0 %v2587_v24 }
 0x9c3   :  { %2139 = vmatprep.subr.bf16.mxu1 %v2739_v22  ;;  %1343 = vmatprep.subr.mxu0 %v3034_v28 }
 0x9c6   :  { %2141 = vmatpush1.bf16.msra.mxu1 %v2754_v32  ;;  %1344 = vmatpush1.msra.mxu0 %v2603_v27 }
 0x9c7   :  { %2143 = vmatprep.subr.bf16.mxu1 %v2757_v34  ;;  %2167 = vmatprep.subr.bf16.mxu0 %v2653_v49 }
 0x9ca   :  { %2145 = vmatpush1.bf16.msra.mxu1 %v2772_v42 }
 0x9cb   :  { %2147 = vmatprep.subr.bf16.mxu1 %v2775_v43 }
 0x9ce   :  { %2149 = vmatpush1.bf16.msra.mxu1 %v2784_v47 }
 0x9cf   :  { %2199 = vmatprep.subr.bf16.mxu1 %v2528_v4 }
 0xa84   :  { %v1193_v31 = vpop.f32.mrb[6].mxu1 }
 0xa85   :  { %v1194_v29 = vadd.f32 %v1193_v31, %v2628_v33  ;;  %v1195_v35 = vpop.f32.mrb[7].mxu1 }
 0xa86   :  { %v1196_v48 = vadd.f32 %v1195_v35, %v2634_v39 }
 0xa87   :  { %v1839_v36 = vmul.f32 -1.442695, %v1194_v29  ;;  %v1843_v29 = vld [vmem:[%s3177_s0 + $0xc] sm:$0x3] }
 0xa88   :  { %v1091_v37 = vpop.f32.mrb[12].mxu0  ;;  %v1840_v62 = vmul.f32 -1.442695, %v1196_v48 }
 0xa89   :  { %2361 = vpow2.f32 %v1839_v36  ;;  %v1092_v27 = vadd.f32 %v1091_v37, %v2835_v5  ;;  %v1093_v41 = vpop.f32.mrb[13].mxu0 }
 0xa8a   :  { %v1094_v30 = vadd.f32 %v1093_v41, %v2841_v26 }
 0xa8b   :  { %v1835_v46 = vmul.f32 -1.442695, %v1092_v27 }
 0xa8c   :  { %v1836_v17 = vmul.f32 -1.442695, %v1094_v30 }
 0xa8d   :  { %2363 = vpow2.f32 %v1835_v46 }
 0xa8e   :  { %2365 = vtanh.f32 %v1196_v48 }
 0xa93   :  { %v2362_v7 = vpop.eup %2361 }
 0xa94   :  { %v1204_v50 = vadd.f32 1.0, %v2362_v7 }
 0xa96   :  { %2367 = vrcp.f32 %v1204_v50 }
 0xa97   :  { %v2364_v4 = vpop.eup %2363  ;;  %2369 = vtanh.f32 %v1094_v30 }
 0xa98   :  { %v1102_v38 = vadd.f32 1.0, %v2364_v4  ;;  %v2366_v51 = vpop.eup %2365 }
 0xa9a   :  { %2371 = vrcp.f32 %v1102_v38 }
 0xa9b   :  { %2373 = vpow2.f32 %v1840_v62 }
 0xaa0   :  { %v2368_v52 = vpop.eup %2367 }
 0xaa1   :  { %v1212_v55 = vmul.f32 %v2368_v52, %v2366_v51  ;;  %v2370_v40 = vpop.eup %2369  ;;  %v1211_v0 = vmul.f32 %v2368_v52, %v2997_v61 }
 0xaa3   :  { %1214 = vrot.lane.b32.xlu1 %v1212_v55, %s2448_s3 }
 0xaa4   :  { %v2372_v44 = vpop.eup %2371 }
 0xaa5   :  { %v1110_v57 = vmul.f32 %v2372_v44, %v2370_v40  ;;  %v2374_v58 = vpop.eup %2373  ;;  %v1109_v16 = vmul.f32 %v2372_v44, %v3003_v45 }
 0xaa6   :  { %v1205_v63 = vadd.f32 1.0, %v2374_v58 }
 0xaa7   :  { %1112 = vrot.lane.b32.xlu1 %v1110_v57, %s2448_s3 }
 0xaa8   :  { %2375 = vrcp.f32 %v1205_v63 }
 0xab2   :  { %v2376_v56 = vpop.eup %2375 }
 0xb15   :  { %v1215_v6 = vpop.permute.xlu1 %1214 }
 0xb16   :  { %v3052_v25 = vadd.f32 %v1215_v6, %v1211_v0 }
 0xb18   :  { %2377 = vtanh.f32 %v3052_v25 }
 0xb19   :  { %2379 = vpow2.f32 %v1836_v17  ;;  %v1113_v18 = vpop.permute.xlu1 %1112 }
 0xb1a   :  { %v3058_v61 = vadd.f32 %v1113_v18, %v1109_v16 }
 0xb1c   :  { %2381 = vtanh.f32 %v3058_v61 }
 0xb22   :  { %v2378_v10 = vpop.eup %2377 }
 0xb23   :  { %v1219_v13 = vmul.f32 %v2378_v10, %v2376_v56  ;;  %v2380_v23 = vpop.eup %2379 }
 0xb24   :  { %v1103_v31 = vadd.f32 1.0, %v2380_v23 }
 0xb25   :  { %1320 = vrot.lane.b32.xlu0 %v1219_v13, %s2449_s4 }
 0xb26   :  { %2383 = vrcp.f32 %v1103_v31  ;;  %v2382_v35 = vpop.eup %2381 }
 0xb29   :  { %1221 = vrot.lane.b32.xlu0 %v1219_v13, %s2448_s3 }
 0xb30   :  { %v2384_v27 = vpop.eup %2383 }
 0xb31   :  { %v1117_v41 = vmul.f32 %v2384_v27, %v2382_v35  ;;  %v1849_v35 = vld [vmem:[%s3177_s0 + $0xe] sm:$0x3] }
 0xb97   :  { %v1321_v36 = vpop.permute.xlu0 %1320 }
 0xb98   :  { %v1323_v37 = vsel %vm120_vm0, %v1843_v29, %v1321_v36 }
 0xb99   :  { %1844 = vmatmul.mubr.msk.f32.vlgmr.msra.gmra.mrb[14].mxu0 %vm122_vm1, %v1323_v37 }
 0xb9a   :  { %2169 = vmatpush1.bf16.msra.mxu0 %v2664_v53  ;;  %1489 = vmatprep.mubr.f32.mxu0 %v2447_v3 }
 0xb9b   :  { %v1222_v45 = vpop.permute.xlu0 %1221  ;;  %2171 = vmatprep.subr.bf16.mxu0 %v2666_v54 }
 0xb9c   :  { %v1224_v46 = vsel %vm223_vm2, %v1222_v45, %v1117_v41 }
 0xb9d   :  { %1290 = vmatmul.mubr.f32.vlgmr.msra.gmra.mrb[8].mxu1 %v1224_v46 }
 0xb9e   :  { %2173 = vmatpush1.bf16.msra.mxu0 %v2682_v59  ;;  %2201 = vmatpush1.bf16.msra.mxu1 %v2539_v8  ;;  %v2446_v8 = vld [vmem:[%s3176_s2 + $0x80] sm:$0xff] }
 0xb9f   :  { %2175 = vmatprep.subr.bf16.mxu0 %v2685_v60  ;;  %2203 = vmatprep.subr.bf16.mxu1 %v2541_v9 }
 0xba0   :  { %1591 = vmatprep.mubr.f32.mxu1 %v2447_v3 }
 0xba2   :  { %2177 = vmatpush1.bf16.msra.mxu0 %v2700_v1  ;;  %2205 = vmatpush1.bf16.msra.mxu1 %v2557_v14 }
 0xba3   :  { %2179 = vmatprep.subr.bf16.mxu0 %v2703_v2  ;;  %2207 = vmatprep.subr.bf16.mxu1 %v2560_v15 }
 0xba6   :  { %2181 = vmatpush1.bf16.msra.mxu0 %v2718_v11  ;;  %2209 = vmatpush1.bf16.msra.mxu1 %v2575_v20 }
 0xba7   :  { %2183 = vmatprep.subr.bf16.mxu0 %v2721_v12  ;;  %2211 = vmatprep.subr.bf16.mxu1 %v2578_v21 }
 0xbaa   :  { %2185 = vmatpush1.bf16.msra.mxu0 %v2736_v19  ;;  %2213 = vmatpush1.bf16.msra.mxu1 %v2587_v24 }
 0xbab   :  { %2187 = vmatprep.subr.bf16.mxu0 %v2739_v22  ;;  %1543 = vmatprep.subr.mxu1 %v3034_v28 }
 0xbae   :  { %2189 = vmatpush1.bf16.msra.mxu0 %v2754_v32  ;;  %1544 = vmatpush1.msra.mxu1 %v2446_v8 }
 0xbaf   :  { %2191 = vmatprep.subr.bf16.mxu0 %v2757_v34  ;;  %2215 = vmatprep.subr.bf16.mxu1 %v2653_v49 }
 0xbb2   :  { %2193 = vmatpush1.bf16.msra.mxu0 %v2772_v42 }
 0xbb3   :  { %2195 = vmatprep.subr.bf16.mxu0 %v2775_v43 }
 0xbb6   :  { %2197 = vmatpush1.bf16.msra.mxu0 %v2784_v47 }
 0xc6c   :  { %v1393_v9 = vpop.f32.mrb[14].mxu0 }
 0xc6d   :  { %v1394_v14 = vadd.f32 %v1393_v9, %v2628_v33  ;;  %v1395_v15 = vpop.f32.mrb[15].mxu0 }
 0xc6e   :  { %v1396_v49 = vadd.f32 %v1395_v15, %v2634_v39 }
 0xc6f   :  { %v1845_v20 = vmul.f32 -1.442695, %v1394_v14 }
 0xc70   :  { %v1291_v21 = vpop.f32.mrb[8].mxu1  ;;  %v1846_v62 = vmul.f32 -1.442695, %v1396_v49 }
 0xc71   :  { %2385 = vpow2.f32 %v1845_v20  ;;  %v1292_v24 = vadd.f32 %v1291_v21, %v2835_v5  ;;  %v1293_v28 = vpop.f32.mrb[9].mxu1 }
 0xc72   :  { %v1294_v30 = vadd.f32 %v1293_v28, %v2841_v26 }
 0xc73   :  { %v1841_v48 = vmul.f32 -1.442695, %v1292_v24 }
 0xc74   :  { %v1842_v18 = vmul.f32 -1.442695, %v1294_v30 }
 0xc75   :  { %2387 = vpow2.f32 %v1841_v48 }
 0xc76   :  { %2389 = vtanh.f32 %v1396_v49 }
 0xc7b   :  { %v2386_v7 = vpop.eup %2385 }
 0xc7c   :  { %v1404_v50 = vadd.f32 1.0, %v2386_v7 }
 0xc7e   :  { %2391 = vrcp.f32 %v1404_v50 }
 0xc7f   :  { %v2388_v4 = vpop.eup %2387  ;;  %2393 = vtanh.f32 %v1294_v30 }
 0xc80   :  { %v1302_v38 = vadd.f32 1.0, %v2388_v4  ;;  %v2390_v51 = vpop.eup %2389 }
 0xc82   :  { %2395 = vrcp.f32 %v1302_v38 }
 0xc83   :  { %2397 = vpow2.f32 %v1846_v62 }
 0xc88   :  { %v2392_v52 = vpop.eup %2391 }
 0xc89   :  { %v1412_v55 = vmul.f32 %v2392_v52, %v2390_v51  ;;  %v2394_v40 = vpop.eup %2393  ;;  %v1411_v0 = vmul.f32 %v2392_v52, %v3052_v25 }
 0xc8b   :  { %1414 = vrot.lane.b32.xlu1 %v1412_v55, %s2448_s3 }
 0xc8c   :  { %v2396_v44 = vpop.eup %2395 }
 0xc8d   :  { %v1310_v57 = vmul.f32 %v2396_v44, %v2394_v40  ;;  %v2398_v58 = vpop.eup %2397  ;;  %v1309_v23 = vmul.f32 %v2396_v44, %v3058_v61 }
 0xc8e   :  { %v1405_v63 = vadd.f32 1.0, %v2398_v58 }
 0xc8f   :  { %1312 = vrot.lane.b32.xlu1 %v1310_v57, %s2448_s3 }
 0xc90   :  { %2399 = vrcp.f32 %v1405_v63 }
 0xc9a   :  { %v2400_v10 = vpop.eup %2399 }
 0xcfd   :  { %v1415_v6 = vpop.permute.xlu1 %1414 }
 0xcfe   :  { %v3103_v56 = vadd.f32 %v1415_v6, %v1411_v0 }
 0xd00   :  { %2401 = vtanh.f32 %v3103_v56 }
 0xd01   :  { %2403 = vpow2.f32 %v1842_v18  ;;  %v1313_v16 = vpop.permute.xlu1 %1312 }
 0xd02   :  { %v3109_v25 = vadd.f32 %v1313_v16, %v1309_v23  ;;  %v1855_v23 = vld [vmem:[%s3181_s6] ss:$0 sm:$0xff] }
 0xd04   :  { %2405 = vtanh.f32 %v3109_v25 }
 0xd0a   :  { %v2402_v13 = vpop.eup %2401 }
 0xd0b   :  { %v1419_v17 = vmul.f32 %v2402_v13, %v2400_v10  ;;  %v2404_v31 = vpop.eup %2403 }
 0xd0c   :  { %v1303_v29 = vadd.f32 1.0, %v2404_v31 }
 0xd0d   :  { %1520 = vrot.lane.b32.xlu0 %v1419_v17, %s2449_s4 }
 0xd0e   :  { %2407 = vrcp.f32 %v1303_v29  ;;  %v2406_v36 = vpop.eup %2405 }
 0xd11   :  { %1421 = vrot.lane.b32.xlu0 %v1419_v17, %s2448_s3 }
 0xd18   :  { %v2408_v41 = vpop.eup %2407 }
 0xd19   :  { %v1317_v45 = vmul.f32 %v2408_v41, %v2406_v36  ;;  %v17_v41 = vstv %s3182_s7 }
 0xd1a   :  { %18 = vst [vmem:[#allocation2] sm:$0x1] %v17_v41 }
 0xd7f   :  { %v1521_v37 = vpop.permute.xlu0 %1520 }
 0xd80   :  { %v1523_v27 = vsel %vm120_vm0, %v1849_v35, %v1521_v37 }
 0xd81   :  { %1850 = vmatmul.mubr.msk.f32.vlgmr.msra.gmra.mrb[10].mxu1 %vm122_vm1, %v1523_v27 }
 0xd82   :  { %2217 = vmatpush1.bf16.msra.mxu1 %v2664_v53  ;;  %1689 = vmatprep.mubr.f32.mxu1 %v2447_v3 }
 0xd83   :  { %v1422_v61 = vpop.permute.xlu0 %1421  ;;  %2219 = vmatprep.subr.bf16.mxu1 %v2666_v54 }
 0xd84   :  { %v1424_v46 = vsel %vm223_vm2, %v1422_v61, %v1317_v45 }
 0xd85   :  { %1490 = vmatmul.mubr.f32.vlgmr.msra.gmra.mrb[16].mxu0 %v1424_v46 }
 0xd86   :  { %2221 = vmatpush1.bf16.msra.mxu1 %v2682_v59 }
 0xd87   :  { %2223 = vmatprep.subr.bf16.mxu1 %v2685_v60 }
 0xd8a   :  { %2225 = vmatpush1.bf16.msra.mxu1 %v2700_v1 }
 0xd8b   :  { %2227 = vmatprep.subr.bf16.mxu1 %v2703_v2 }
 0xd8e   :  { %2229 = vmatpush1.bf16.msra.mxu1 %v2718_v11 }
 0xd8f   :  { %2231 = vmatprep.subr.bf16.mxu1 %v2721_v12 }
 0xd92   :  { %2233 = vmatpush1.bf16.msra.mxu1 %v2736_v19 }
 0xd93   :  { %2235 = vmatprep.subr.bf16.mxu1 %v2739_v22 }
 0xd96   :  { %2237 = vmatpush1.bf16.msra.mxu1 %v2754_v32 }
 0xd97   :  { %2239 = vmatprep.subr.bf16.mxu1 %v2757_v34 }
 0xd9a   :  { %2241 = vmatpush1.bf16.msra.mxu1 %v2772_v42 }
 0xd9b   :  { %2243 = vmatprep.subr.bf16.mxu1 %v2775_v43 }
 0xd9e   :  { %2245 = vmatpush1.bf16.msra.mxu1 %v2784_v47 }
 0xe54   :  { %v1593_v3 = vpop.f32.mrb[10].mxu1 }
 0xe55   :  { %v1594_v53 = vadd.f32 %v1593_v3, %v2628_v33  ;;  %v1595_v54 = vpop.f32.mrb[11].mxu1 }
 0xe56   :  { %v1596_v12 = vadd.f32 %v1595_v54, %v2634_v39 }
 0xe57   :  { %v1851_v59 = vmul.f32 -1.442695, %v1594_v53 }
 0xe58   :  { %v1491_v60 = vpop.f32.mrb[16].mxu0  ;;  %v1852_v39 = vmul.f32 -1.442695, %v1596_v12 }
 0xe59   :  { %2409 = vpow2.f32 %v1851_v59  ;;  %v1492_v1 = vadd.f32 %v1491_v60, %v2835_v5  ;;  %v1493_v2 = vpop.f32.mrb[17].mxu0  ;;  %v2451_v59 = vmov 0   ;;  %v1856_v60 = vld [vmem:[#allocation2] ss:$0 sm:$0xff] }
 0xe5a   :  { %v1494_v32 = vadd.f32 %v1493_v2, %v2841_v26  ;;  %2251 = vset.pattern.permute.xlu1 %v2451_v59  ;;  %2252 = vset.pattern.permute.xlu0 %v2451_v59 }
 0xe5b   :  { %v1847_v11 = vmul.f32 -1.442695, %v1492_v1 }
 0xe5c   :  { %v1848_v50 = vmul.f32 -1.442695, %v1494_v32 }
 0xe5d   :  { %2411 = vpow2.f32 %v1847_v11  ;;  %v1760_v11 = vld [vmem:[%s3183_s1] sm:$0x3] }
 0xe5e   :  { %2413 = vtanh.f32 %v1596_v12  ;;  %v19_v12 = vstv %s3184_s11 }
 0xe5f   :  { %20 = vst [vmem:[#allocation3] sm:$0x1] %v19_v12 }
 0xe63   :  { %v2410_v19 = vpop.eup %2409 }
 0xe64   :  { %v1604_v22 = vadd.f32 1.0, %v2410_v19 }
 0xe66   :  { %2415 = vrcp.f32 %v1604_v22  ;;  %v1857_v22 = vld [vmem:[%s3185_s8] ss:$0 sm:$0xff] }
 0xe67   :  { %v2412_v34 = vpop.eup %2411  ;;  %2417 = vtanh.f32 %v1494_v32  ;;  %v1858_v32 = vld [vmem:[%s3185_s8 + $0x1] ss:$0 sm:$0xff] }
 0xe68   :  { %v1502_v42 = vadd.f32 1.0, %v2412_v34  ;;  %v2414_v33 = vpop.eup %2413 }
 0xe6a   :  { %2419 = vrcp.f32 %v1502_v42 }
 0xe6b   :  { %2421 = vpow2.f32 %v1852_v39 }
 0xe70   :  { %v2416_v43 = vpop.eup %2415 }
 0xe71   :  { %v1612_v47 = vmul.f32 %v2416_v43, %v2414_v33  ;;  %v2418_v8 = vpop.eup %2417  ;;  %v1611_v21 = vmul.f32 %v2416_v43, %v3103_v56  ;;  %v1859_v43 = vld [vmem:[%s3186_s9] ss:$0 sm:$0xff] }
 0xe73   :  { %1614 = vrot.lane.b32.xlu1 %v1612_v47, %s2448_s3 }
 0xe74   :  { %v2420_v9 = vpop.eup %2419 }
 0xe75   :  { %v1510_v14 = vmul.f32 %v2420_v9, %v2418_v8  ;;  %v2422_v15 = vpop.eup %2421  ;;  %v1509_v4 = vmul.f32 %v2420_v9, %v3109_v25  ;;  %v1860_v8 = vld [vmem:[%s3187_s10] ss:$0 sm:$0xff] }
 0xe76   :  { %v1605_v20 = vadd.f32 1.0, %v2422_v15  ;;  %v1861_v15 = vld [vmem:[#allocation3] ss:$0 sm:$0xff] }
 0xe77   :  { %1512 = vrot.lane.b32.xlu0 %v1510_v14, %s2448_s3 }
 0xe78   :  { %2423 = vrcp.f32 %v1605_v20 }
 0xe82   :  { %v2424_v48 = vpop.eup %2423 }
 0xee5   :  { %v1615_v24 = vpop.permute.xlu1 %1614 }
 0xee6   :  { %v1617_v28 = vadd.f32 %v1615_v24, %v1611_v21 }
 0xee8   :  { %2425 = vtanh.f32 %v1617_v28 }
 0xee9   :  { %2427 = vpow2.f32 %v1848_v50  ;;  %v1513_v30 = vpop.permute.xlu0 %1512 }
 0xeea   :  { %v1515_v51 = vadd.f32 %v1513_v30, %v1509_v4 }
 0xeec   :  { %2429 = vtanh.f32 %v1515_v51 }
 0xef2   :  { %v2426_v49 = vpop.eup %2425 }
 0xef3   :  { %v1619_v7 = vmul.f32 %v2426_v49, %v2424_v48  ;;  %v2428_v38 = vpop.eup %2427 }
 0xef4   :  { %v1503_v52 = vadd.f32 1.0, %v2428_v38 }
 0xef5   :  { %1621 = vrot.lane.b32.xlu1 %v1619_v7, %s2448_s3 }
 0xef6   :  { %2431 = vrcp.f32 %v1503_v52  ;;  %v2430_v55 = vpop.eup %2429 }
 0xf00   :  { %v2432_v40 = vpop.eup %2431 }
 0xf01   :  { %v1517_v44 = vmul.f32 %v2432_v40, %v2430_v55 }
 0xf67   :  { %v1622_v57 = vpop.permute.xlu1 %1621 }
 0xf68   :  { %v1624_v62 = vsel %vm223_vm2, %v1622_v57, %v1517_v44 }
 0xf69   :  { %1690 = vmatmul.mubr.f32.vlgmr.msra.gmra.mrb[12].mxu1 %v1624_v62 }
0x103c   :  { %v1691_v58 = vpop.f32.mrb[12].mxu1 }
0x103d   :  { %v1692_v63 = vadd.f32 %v1691_v58, %v2835_v5  ;;  %v1693_v0 = vpop.f32.mrb[13].mxu1 }
0x103e   :  { %v1694_v56 = vadd.f32 %v1693_v0, %v2841_v26 }
0x103f   :  { %v1853_v6 = vmul.f32 -1.442695, %v1692_v63 }
0x1040   :  { %v1854_v5 = vmul.f32 -1.442695, %v1694_v56 }
0x1041   :  { %2433 = vpow2.f32 %v1853_v6 }
0x1042   :  { %2435 = vtanh.f32 %v1694_v56 }
0x104b   :  { %v2434_v10 = vpop.eup %2433 }
0x104c   :  { %v1702_v13 = vadd.f32 1.0, %v2434_v10  ;;  %v2436_v17 = vpop.eup %2435 }
0x104e   :  { %2437 = vrcp.f32 %v1702_v13 }
0x104f   :  { %2439 = vpow2.f32 %v1854_v5 }
0x1058   :  { %v2438_v18 = vpop.eup %2437 }
0x1059   :  { %v1710_v16 = vmul.f32 %v2438_v18, %v2436_v17  ;;  %v2440_v31 = vpop.eup %2439  ;;  %v1709_v26 = vmul.f32 %v2438_v18, %v1515_v51 }
0x105a   :  { %v1703_v25 = vadd.f32 1.0, %v2440_v31 }
0x105b   :  { %1712 = vrot.lane.b32.xlu0 %v1710_v16, %s2448_s3 }
0x105c   :  { %2441 = vrcp.f32 %v1703_v25 }
0x105f   :  { %1729 = vrot.lane.b32.xlu0 %v1855_v23, %s2448_s3 }
0x1066   :  { %v2442_v36 = vpop.eup %2441 }
0x10cd   :  { %v1713_v29 = vpop.permute.xlu0 %1712 }
0x10ce   :  { %v1715_v35 = vadd.f32 %v1713_v29, %v1709_v26 }
0x10d0   :  { %2443 = vtanh.f32 %v1715_v35 }
0x10d1   :  { %v1730_v61 = vpop.permute.xlu0 %1729 }
0x10da   :  { %v2444_v37 = vpop.eup %2443 }
0x10db   :  { %v1717_v27 = vmul.f32 %v2444_v37, %v2442_v36 }
0x10dd   :  { %1719 = vrot.lane.b32.xlu1 %v1717_v27, %s2450_s17 }
0x114f   :  { %v1720_v45 = vpop.permute.xlu1 %1719 }
0x1150   :  { %v1722_v46 = vadd.f32 %v1720_v45, %v1717_v27 }
0x1152   :  { %v1732_v3 = vmul.f32 %v1730_v61, %v1722_v46 }
0x1154   :  { %1734 = vrot.lane.b32.xlu1 %v1732_v3, %s2448_s3 }
0x11c6   :  { %v1735_v53 = vpop.permute.xlu1 %1734 }
0x11c7   :  { %v1738_v54 = vsel %vm1737_vm3, %v1735_v53, 0.0 }
0x11c8   :  { %1739 = vadd.xlane.f32.xlu0 %v1738_v54 }
0x1255   :  { %v1740_v1 = vpop.xlane.xlu0 %1739 }
0x1256   :  { %v1748_v2 = vadd.f32 %v1856_v60, %v1740_v1 }
0x1258   :  { %1752 = vperm.xlu1 %2251, %v1748_v2  }
0x125c   :  { %1764 = vperm.xlu1 %2251, %v1760_v11  }
0x12d7   :  { %v1753_v19 = vpop.permute.xlu1 %1752 }
0x12d8   :  { %v1759_v42 = vmul.f32 %v1857_v22, %v1753_v19 }
0x12db   :  { %v1765_v34 = vpop.permute.xlu1 %1764 }
0x12dc   :  { %v1771_v33 = vmul.f32 %v1858_v32, %v1765_v34 }
0x12de   :  { %v1772_v47 = vadd.f32 %v1771_v33, %v1759_v42 }
0x12e0   :  { %v1780_v9 = vadd.f32 %v1859_v43, %v1772_v47 }
0x12e2   :  { %v1788_v14 = vmul.f32 %v1860_v8, %v1780_v9 }
0x12e4   :  { %v1790_v39 = vsel %vm1789_vm4, %v1788_v14, 0.0 }
0x12e5   :  { %1791 = vadd.xlane.f32.xlu1 %v1790_v39 }
0x1372   :  { %v1792_v20 = vpop.xlane.xlu1 %1791 }
0x1373   :  { %v1800_v21 = vadd.f32 %v1861_v15, %v1792_v20 }
0x1375   :  { %1802 = vst.msk [vmem:[%s3188_s12] sm:$0x3] %vm1801_vm5, %v1800_v21 }

</bundles_post_ra>
